<compile_context>
chip_gen: v5e
topology: v5e:2x2
jax: 0.10.0
libtpu: 0.0.40
codegen_flags: <defaults>
</compile_context>

<pallas_src>
import functools

import jax
import jax.numpy as jnp
from jax import lax
from jax.experimental import pallas as pl
from jax.experimental.pallas import tpu as pltpu

_EPS = 1e-12      # matches F.normalize eps
_MASK = -1e30     # additive mask for padded rows / columns


def _contrastive_kernel(
    img_ref, txt_ref,                                   # inputs
    out_total_ref, out_i2t_ref, out_t2i_ref,            # outputs, each (1, 1)
    txt_s_ref, m_row_ref, l_row_ref, m_col_ref, l_col_ref,
    row_acc_ref, col_acc_ref, diag_acc_ref,              # scratch
    *, batch, tile, needs_mask, col_exact):
    j = pl.program_id(0)          # text (column) block  — outer grid axis
    i = pl.program_id(1)          # image (row) block    — inner grid axis
    n_cb = pl.num_programs(0)
    n_rb = pl.num_programs(1)

    # ---- one-time scalar accumulator init --------------------------------
    @pl.when(jnp.logical_and(j == 0, i == 0))
    def _init_accs():
        row_acc_ref[...] = jnp.zeros_like(row_acc_ref)
        col_acc_ref[...] = jnp.zeros_like(col_acc_ref)
        diag_acc_ref[...] = jnp.zeros_like(diag_acc_ref)

    # ---- per-column-block prep: normalize text tile once, reset col stats -
    @pl.when(i == 0)
    def _prep_col_block():
        txt = txt_ref[...].astype(jnp.float32)                       # [D, Tc]
        inv_n = lax.rsqrt(
            jnp.maximum(jnp.sum(txt * txt, axis=0, keepdims=True), _EPS * _EPS))
        txt_s_ref[...] = (txt * inv_n).astype(txt_s_ref.dtype)       # bf16 cache
        m_col_ref[...] = jnp.full_like(m_col_ref, -jnp.inf)
        l_col_ref[...] = jnp.zeros_like(l_col_ref)

    r0 = pl.multiple_of(i * tile, tile)

    # ---- per-row-block init (only while visiting the first column block) --
    @pl.when(j == 0)
    def _init_row_stats():
        m_row_ref[pl.ds(r0, tile), :] = jnp.full((tile, 1), -jnp.inf, jnp.float32)
        l_row_ref[pl.ds(r0, tile), :] = jnp.zeros((tile, 1), jnp.float32)

    # ---- similarity tile: bf16 MXU matmul, f32 accumulate -----------------
    # image rows already L2-normalized and scaled by 1/temperature (wrapper),
    # text block normalized above; contraction is canonical [M,K]x[K,N].
    sim = lax.dot_general(
        img_ref[...], txt_s_ref[...],
        dimension_numbers=(((1,), (0,)), ((), ())),
        preferred_element_type=jnp.float32)                           # [Tr, Tc]

    if needs_mask:
        c0 = pl.multiple_of(j * tile, tile)
        col_ok = (lax.broadcasted_iota(jnp.int32, (1, tile), 1) + c0) < batch
        row_ok = (lax.broadcasted_iota(jnp.int32, (tile, 1), 0) + r0) < batch
        sim = sim + jnp.where(col_ok, 0.0, _MASK) + jnp.where(row_ok, 0.0, _MASK)

    # ---- row-direction (image->text) online softmax ------------------------
    m_prev = m_row_ref[pl.ds(r0, tile), :]
    l_prev = l_row_ref[pl.ds(r0, tile), :]
    m_blk = jnp.max(sim, axis=1, keepdims=True)
    m_new = jnp.maximum(m_prev, m_blk)
    p = jnp.exp(sim - m_new)                    # only [Tr,Tc] exp pass (default path)
    l_new = jnp.exp(m_prev - m_new) * l_prev + jnp.sum(p, axis=1, keepdims=True)
    m_row_ref[pl.ds(r0, tile), :] = m_new
    l_row_ref[pl.ds(r0, tile), :] = l_new

    # ---- column-direction (text->image) online softmax ---------------------
    m_col_prev = m_col_ref[...]
    l_col_prev = l_col_ref[...]
    if col_exact:
        # Numerically exact branch (used when 1/T > 40, i.e. T < 0.025).
        mc_blk = jnp.max(sim, axis=0, keepdims=True)
        m_col_new = jnp.maximum(m_col_prev, mc_blk)
        p_c = jnp.exp(sim - m_col_new)
        l_col_new = (jnp.exp(m_col_prev - m_col_new) * l_col_prev
                     + jnp.sum(p_c, axis=0, keepdims=True))
    else:
        # Reconstruct the block's column exp-sums from the row-shifted p with a
        # per-block scalar shift (no overflow; exact for |logits| spread < ~88,
        # guaranteed by normalized features when 2/T < 88).
        s_blk = jnp.max(m_new, axis=0, keepdims=True)                 # [1, 1]
        w = jnp.exp(m_new - s_blk)                                    # [Tr, 1], <= 1
        col_part = jnp.sum(p * w, axis=0, keepdims=True)              # [1, Tc]
        m_col_new = jnp.maximum(m_col_prev, s_blk)
        l_col_new = (jnp.exp(m_col_prev - m_col_new) * l_col_prev
                     + col_part * jnp.exp(s_blk - m_col_new))
    m_col_ref[...] = m_col_new
    l_col_ref[...] = l_col_new

    # ---- diagonal (target logits), only on aligned blocks (i == j) --------
    @pl.when(i == j)
    def _diag():
        ri = lax.broadcasted_iota(jnp.int32, (tile, tile), 0)
        ci = lax.broadcasted_iota(jnp.int32, (tile, tile), 1)
        d = jnp.sum(jnp.where(ri == ci, sim, 0.0), axis=1, keepdims=True)
        if needs_mask:
            ok = (lax.broadcasted_iota(jnp.int32, (tile, 1), 0) + r0) < batch
            d = jnp.where(ok, d, 0.0)
        diag_acc_ref[...] += jnp.sum(d, axis=0, keepdims=True)

    # ---- finalize row LSE for this row block (last column block) ----------
    @pl.when(j == n_cb - 1)
    def _row_final():
        lse_r = m_new + jnp.log(l_new)
        if needs_mask:
            ok = (lax.broadcasted_iota(jnp.int32, (tile, 1), 0) + r0) < batch
            lse_r = jnp.where(ok, lse_r, 0.0)
        row_acc_ref[...] += jnp.sum(lse_r, axis=0, keepdims=True)

    # ---- finalize column LSE for this column block (last row block) -------
    @pl.when(i == n_rb - 1)
    def _col_final():
        lse_c = m_col_new + jnp.log(l_col_new)
        if needs_mask:
            c0f = pl.multiple_of(j * tile, tile)
            ok = (lax.broadcasted_iota(jnp.int32, (1, tile), 1) + c0f) < batch
            lse_c = jnp.where(ok, lse_c, 0.0)
        col_acc_ref[...] += jnp.sum(lse_c, axis=1, keepdims=True)

    # ---- emit outputs at the very last grid step ---------------------------
    @pl.when(jnp.logical_and(j == n_cb - 1, i == n_rb - 1))
    def _emit():
        inv_b = jnp.float32(1.0 / batch)
        i2t = (row_acc_ref[...] - diag_acc_ref[...]) * inv_b
        t2i = (col_acc_ref[...] - diag_acc_ref[...]) * inv_b
        out_total_ref[...] = 0.5 * (i2t + t2i)
        out_i2t_ref[...] = i2t
        out_t2i_ref[...] = t2i


def _round_up(x, m):
    return ((x + m - 1) // m) * m


def _vmem_capacity_bytes():
    try:
        info = pltpu.get_tpu_info()
        cap = int(getattr(info, "vmem_capacity_bytes", 0))
        if cap > 0:
            return cap
    except Exception:
        pass
    return 64 * 1024 * 1024   # conservative default (v7x per-TC VMEM)


def _pick_tile(batch, d_pad, vmem_budget):
    """Largest square tile that fits the VMEM budget without inflating padding."""
    candidates = (1024, 512, 256, 128)

    def estimate(tile):
        img_io = 2 * tile * d_pad * 2         # bf16 image tile, double-buffered
        txt_io = 2 * d_pad * tile * 4         # f32 text tile, double-buffered
        txt_s = d_pad * tile * 2              # bf16 normalized text cache
        stats = 2 * _round_up(batch, tile) * 4 + 2 * tile * 4
        temps = 6 * tile * tile * 4           # sim / p / masks headroom
        return img_io + txt_io + txt_s + stats + temps + (1 << 20)

    feasible = [t for t in candidates if estimate(t) <= vmem_budget] or [128]
    best_pad = min(_round_up(batch, t) for t in feasible)
    for t in feasible:                        # descending: prefer biggest tile
        if _round_up(batch, t) == best_pad:
            return t
    return 128


def contrastive_loss(image_feature, text_feature, temperature=0.07):
    """Returns (total_loss, {'image2text_loss': ..., 'text2image_loss': ...})."""
    B, D = image_feature.shape
    assert text_feature.shape == (B, D)
    inv_temp = float(1.0 / temperature)

    D_pad = _round_up(max(D, 128), 128)
    cap = _vmem_capacity_bytes()
    budget = min(int(0.5 * cap), 100 * 1024 * 1024)
    tile = _pick_tile(B, D_pad, budget)
    B_pad = _round_up(max(B, tile), tile)
    n_blk = B_pad // tile
    needs_mask = (B_pad != B)
    col_exact = inv_temp > 40.0   # switch to exact column softmax for tiny T

    # Image branch: L2-normalize + fold 1/temperature, cast bf16, pad with zeros.
    # Done once in XLA because the kernel re-reads image tiles once per column
    # block (doing it in-kernel would redo the work n_blk times).
    imgf = image_feature.astype(jnp.float32)
    norm = jnp.sqrt(jnp.sum(imgf * imgf, axis=-1, keepdims=True))
    img_n = (imgf / jnp.maximum(norm, _EPS) * inv_temp).astype(jnp.bfloat16)
    img_p = jnp.pad(img_n, ((0, B_pad - B), (0, D_pad - D)))

    # Text branch: raw features, pre-transposed to [D, B] (canonical MXU RHS),
    # normalized in-kernel once per column block.
    txt_t = jnp.pad(text_feature.T, ((0, D_pad - D), (0, B_pad - B)))

    kernel = functools.partial(
        _contrastive_kernel, batch=B, tile=tile,
        needs_mask=needs_mask, col_exact=col_exact)

    out_shape = tuple(jax.ShapeDtypeStruct((1, 1), jnp.float32) for _ in range(3))

    grid_spec = pltpu.PrefetchScalarGridSpec(
        num_scalar_prefetch=0,
        grid=(n_blk, n_blk),                 # (text col blocks outer, image row blocks inner)
        in_specs=[
            pl.BlockSpec((tile, D_pad), lambda j, i: (i, 0)),   # image rows (inner axis)
            pl.BlockSpec((D_pad, tile), lambda j, i: (0, j)),   # text cols (outer; re-fetch skipped)
        ],
        out_specs=tuple(pl.BlockSpec((1, 1), lambda j, i: (0, 0)) for _ in range(3)),
        scratch_shapes=[
            pltpu.VMEM((D_pad, tile), jnp.bfloat16),   # normalized text block (bf16)
            pltpu.VMEM((B_pad, 1), jnp.float32),       # row running max
            pltpu.VMEM((B_pad, 1), jnp.float32),       # row running exp-sum
            pltpu.VMEM((1, tile), jnp.float32),        # column running max (per col block)
            pltpu.VMEM((1, tile), jnp.float32),        # column running exp-sum
            pltpu.VMEM((1, 1), jnp.float32),           # accumulated row LSE
            pltpu.VMEM((1, 1), jnp.float32),           # accumulated column LSE
            pltpu.VMEM((1, 1), jnp.float32),           # accumulated diagonal
        ],
    )
    # TODO(synk): v7x dual-TensorCore split (parallel row-shard + wrapper-side
    # merge of per-shard column stats) and K-dim tiling for very large embed_dim.

    vmem_limit = max(32 * 1024 * 1024, min(int(0.75 * cap), 100 * 1024 * 1024))
    total, i2t, t2i = pl.pallas_call(
        kernel,
        out_shape=out_shape,
        grid_spec=grid_spec,
        compiler_params=pltpu.CompilerParams(
            dimension_semantics=("arbitrary", "arbitrary"),
            vmem_limit_bytes=vmem_limit,
        ),
    )(img_p, txt_t)

    total = total[0, 0]
    return total, {"image2text_loss": i2t[0, 0], "text2image_loss": t2i[0, 0]}


# ---------------------------------------------------------------------------
# Pure-JAX references for the self-test.
# ---------------------------------------------------------------------------
def _normalize(x):
    n = jnp.sqrt(jnp.sum(x * x, axis=-1, keepdims=True))
    return x / jnp.maximum(n, _EPS)


def _loss_from_sim(sim):
    lse_r = jax.nn.logsumexp(sim, axis=1)
    lse_c = jax.nn.logsumexp(sim, axis=0)
    diag = jnp.diagonal(sim)
    i2t = jnp.mean(lse_r - diag)
    t2i = jnp.mean(lse_c - diag)
    return 0.5 * (i2t + t2i), i2t, t2i


def _reference_f32(img, txt, temperature):
    im = _normalize(img.astype(jnp.float32))
    tx = _normalize(txt.astype(jnp.float32))
    return _loss_from_sim(im @ tx.T / temperature)


def _reference_mixed(img, txt, temperature):
    # Emulates the kernel's bf16 MXU inputs (f32 accumulation and softmax).
    im = (_normalize(img.astype(jnp.float32)) / temperature)
    im = im.astype(jnp.bfloat16).astype(jnp.float32)
    tx = _normalize(txt.astype(jnp.float32)).astype(jnp.bfloat16).astype(jnp.float32)
    return _loss_from_sim(im @ tx.T)


def _check(got, ref, atol, rtol):
    for g, r in zip(got, ref):
        assert jnp.allclose(g, r, atol=atol, rtol=rtol), (float(g), float(r))


if __name__ == "__main__":
    key = jax.random.PRNGKey(0)
    k1, k2, k3, k4 = jax.random.split(key, 4)

    # Small shapes consistent with the module: [B, embed_dim] features.
    B, D = 8, 32
    image_feature = jax.random.normal(k1, (B, D), dtype=jnp.float32)
    text_feature = jax.random.normal(k2, (B, D), dtype=jnp.float32)

    total, aux = contrastive_loss(image_feature, text_feature, temperature=0.07)
    total = jax.block_until_ready(total)
    aux = jax.tree_util.tree_map(jax.block_until_ready, aux)
    got = (total, aux["image2text_loss"], aux["text2image_loss"])
    _check(got, _reference_mixed(image_feature, text_feature, 0.07), atol=1e-2, rtol=1e-2)
    _check(got, _reference_f32(image_feature, text_feature, 0.07), atol=6e-2, rtol=6e-2)

    # Padding + multiple blocks in both grid axes (B=300 -> B_pad=384, 3x3 grid).
    B2, D2 = 300, 96
    img2 = jax.random.normal(k3, (B2, D2), dtype=jnp.float32)
    txt2 = jax.random.normal(k4, (B2, D2), dtype=jnp.float32)
    total2, aux2 = contrastive_loss(img2, txt2, temperature=0.07)
    total2 = jax.block_until_ready(total2)
    got2 = (total2, aux2["image2text_loss"], aux2["text2image_loss"])
    _check(got2, _reference_mixed(img2, txt2, 0.07), atol=1e-2, rtol=1e-2)
    _check(got2, _reference_f32(img2, txt2, 0.07), atol=6e-2, rtol=6e-2)

    # Small-temperature regime: exercises the exact per-column softmax branch.
    total3, aux3 = contrastive_loss(image_feature, text_feature, temperature=0.01)
    total3 = jax.block_until_ready(total3)
    got3 = (total3, aux3["image2text_loss"], aux3["text2image_loss"])
    assert all(bool(jnp.isfinite(g)) for g in got3)
    _check(got3, _reference_mixed(image_feature, text_feature, 0.01), atol=0.25, rtol=5e-2)

    print("KERNEL_OK")
</pallas_src>

<mosaic_0001>
module attributes {stable_mosaic.version = 11 : i64} {
  func.func @_contrastive_kernel(%arg0: i32, %arg1: i32, %arg2: memref<128x128xbf16, #tpu.memory_space<vmem>>, %arg3: memref<128x128xf32, #tpu.memory_space<vmem>>, %arg4: memref<1x1xf32, #tpu.memory_space<vmem>>, %arg5: memref<1x1xf32, #tpu.memory_space<vmem>>, %arg6: memref<1x1xf32, #tpu.memory_space<vmem>>, %arg7: memref<128x128xbf16, #tpu.memory_space<vmem>>, %arg8: memref<128x1xf32, #tpu.memory_space<vmem>>, %arg9: memref<128x1xf32, #tpu.memory_space<vmem>>, %arg10: memref<1x128xf32, #tpu.memory_space<vmem>>, %arg11: memref<1x128xf32, #tpu.memory_space<vmem>>, %arg12: memref<1x1xf32, #tpu.memory_space<vmem>>, %arg13: memref<1x1xf32, #tpu.memory_space<vmem>>, %arg14: memref<1x1xf32, #tpu.memory_space<vmem>>) attributes {dimension_semantics = [#tpu.dimension_semantics<arbitrary>, #tpu.dimension_semantics<arbitrary>], iteration_bounds = array<i64: 1, 1>, scalar_prefetch = 0 : i64, scratch_operands = 8 : i64, tpu.core_type = #tpu.core_type<tc>, window_params = [{transform_indices = @transform_0, window_bounds = array<i64: 128, 128>}, {transform_indices = @transform_1, window_bounds = array<i64: 128, 128>}, {pipeline_mode = #tpu.pipeline_mode<synchronous>, transform_indices = @transform_2, window_bounds = array<i64: 1, 1>}, {pipeline_mode = #tpu.pipeline_mode<synchronous>, transform_indices = @transform_3, window_bounds = array<i64: 1, 1>}, {pipeline_mode = #tpu.pipeline_mode<synchronous>, transform_indices = @transform_4, window_bounds = array<i64: 1, 1>}]} {
    %c0_i32 = arith.constant 0 : i32
    %0 = arith.cmpi eq, %arg0, %c0_i32 : i32
    %c0_i32_0 = arith.constant 0 : i32
    %1 = arith.cmpi eq, %arg1, %c0_i32_0 : i32
    %2 = arith.andi %0, %1 : i1
    %3 = arith.extui %2 : i1 to i32
    %c0_i32_1 = arith.constant 0 : i32
    %4 = arith.cmpi ne, %3, %c0_i32_1 : i32
    scf.if %4 {
      %cst_39 = arith.constant 0.000000e+00 : f32
      %95 = vector.broadcast %cst_39 : f32 to vector<1x1xf32>
      %c0_40 = arith.constant 0 : index
      %c0_41 = arith.constant 0 : index
      %96 = vector.load %arg12[%c0_40, %c0_41] : memref<1x1xf32, #tpu.memory_space<vmem>>, vector<1x1xf32>
      tpu.vector_store %arg12[%c0_40, %c0_41], %95 {strides = array<i32>} : memref<1x1xf32, #tpu.memory_space<vmem>>, vector<1x1xf32>,
      %cst_42 = arith.constant 0.000000e+00 : f32
      %97 = vector.broadcast %cst_42 : f32 to vector<1x1xf32>
      %c0_43 = arith.constant 0 : index
      %c0_44 = arith.constant 0 : index
      %98 = vector.load %arg13[%c0_43, %c0_44] : memref<1x1xf32, #tpu.memory_space<vmem>>, vector<1x1xf32>
      tpu.vector_store %arg13[%c0_43, %c0_44], %97 {strides = array<i32>} : memref<1x1xf32, #tpu.memory_space<vmem>>, vector<1x1xf32>,
      %cst_45 = arith.constant 0.000000e+00 : f32
      %99 = vector.broadcast %cst_45 : f32 to vector<1x1xf32>
      %c0_46 = arith.constant 0 : index
      %c0_47 = arith.constant 0 : index
      %100 = vector.load %arg14[%c0_46, %c0_47] : memref<1x1xf32, #tpu.memory_space<vmem>>, vector<1x1xf32>
      tpu.vector_store %arg14[%c0_46, %c0_47], %99 {strides = array<i32>} : memref<1x1xf32, #tpu.memory_space<vmem>>, vector<1x1xf32>,
    } else {
    }
    %c0_i32_2 = arith.constant 0 : i32
    %5 = arith.cmpi eq, %arg1, %c0_i32_2 : i32
    %6 = arith.extui %5 : i1 to i32
    %c0_i32_3 = arith.constant 0 : i32
    %7 = arith.cmpi ne, %6, %c0_i32_3 : i32
    scf.if %7 {
      %c0_39 = arith.constant 0 : index
      %c0_40 = arith.constant 0 : index
      %95 = vector.load %arg3[%c0_39, %c0_40] : memref<128x128xf32, #tpu.memory_space<vmem>>, vector<128x128xf32>
      %96 = arith.mulf %95, %95 : vector<128x128xf32>
      %cst_41 = arith.constant dense<0.000000e+00> : vector<128xf32>
      %97 = vector.multi_reduction <add>, %96, %cst_41 [0] : vector<128x128xf32> to vector<128xf32>
      %98 = vector.shape_cast %97 : vector<128xf32> to vector<1x128xf32>
      %cst_42 = arith.constant 1.000000e-24 : f32
      %99 = vector.broadcast %cst_42 : f32 to vector<1x128xf32>
      %100 = arith.maximumf %98, %99 : vector<1x128xf32>
      %101 = math.rsqrt %100 : vector<1x128xf32>
      %102 = vector.broadcast %101 : vector<1x128xf32> to vector<128x128xf32>
      %103 = arith.mulf %95, %102 : vector<128x128xf32>
      %104 = arith.truncf %103 : vector<128x128xf32> to vector<128x128xbf16>
      %c0_43 = arith.constant 0 : index
      %c0_44 = arith.constant 0 : index
      %105 = vector.load %arg7[%c0_43, %c0_44] : memref<128x128xbf16, #tpu.memory_space<vmem>>, vector<128x128xbf16>
      tpu.vector_store %arg7[%c0_43, %c0_44], %104 {strides = array<i32>} : memref<128x128xbf16, #tpu.memory_space<vmem>>, vector<128x128xbf16>,
      %cst_45 = arith.constant 0xFF800000 : f32
      %106 = vector.broadcast %cst_45 : f32 to vector<1x128xf32>
      %c0_46 = arith.constant 0 : index
      %c0_47 = arith.constant 0 : index
      %107 = vector.load %arg10[%c0_46, %c0_47] : memref<1x128xf32, #tpu.memory_space<vmem>>, vector<1x128xf32>
      tpu.vector_store %arg10[%c0_46, %c0_47], %106 {strides = array<i32>} : memref<1x128xf32, #tpu.memory_space<vmem>>, vector<1x128xf32>,
      %cst_48 = arith.constant 0.000000e+00 : f32
      %108 = vector.broadcast %cst_48 : f32 to vector<1x128xf32>
      %c0_49 = arith.constant 0 : index
      %c0_50 = arith.constant 0 : index
      %109 = vector.load %arg11[%c0_49, %c0_50] : memref<1x128xf32, #tpu.memory_space<vmem>>, vector<1x128xf32>
      tpu.vector_store %arg11[%c0_49, %c0_50], %108 {strides = array<i32>} : memref<1x128xf32, #tpu.memory_space<vmem>>, vector<1x128xf32>,
    } else {
    }
    %c128_i32 = arith.constant 128 : i32
    %8 = arith.muli %arg1, %c128_i32 : i32
    %9 = tpu.assume_multiple %8, 128 : i32
    %c0_i32_4 = arith.constant 0 : i32
    %10 = arith.cmpi eq, %arg0, %c0_i32_4 : i32
    %11 = arith.extui %10 : i1 to i32
    %c0_i32_5 = arith.constant 0 : i32
    %12 = arith.cmpi ne, %11, %c0_i32_5 : i32
    scf.if %12 {
      %cst_39 = arith.constant 0xFF800000 : f32
      %95 = vector.broadcast %cst_39 : f32 to vector<128x1xf32>
      %96 = arith.index_cast %9 : i32 to index
      %c0_40 = arith.constant 0 : index
      %97 = vector.load %arg8[%96, %c0_40] : memref<128x1xf32, #tpu.memory_space<vmem>>, vector<128x1xf32>
      tpu.vector_store %arg8[%96, %c0_40], %95 {strides = array<i32>} : memref<128x1xf32, #tpu.memory_space<vmem>>, vector<128x1xf32>,
      %cst_41 = arith.constant 0.000000e+00 : f32
      %98 = vector.broadcast %cst_41 : f32 to vector<128x1xf32>
      %99 = arith.index_cast %9 : i32 to index
      %c0_42 = arith.constant 0 : index
      %100 = vector.load %arg9[%99, %c0_42] : memref<128x1xf32, #tpu.memory_space<vmem>>, vector<128x1xf32>
      tpu.vector_store %arg9[%99, %c0_42], %98 {strides = array<i32>} : memref<128x1xf32, #tpu.memory_space<vmem>>, vector<128x1xf32>,
    } else {
    }
    %c0 = arith.constant 0 : index
    %c0_6 = arith.constant 0 : index
    %13 = vector.load %arg2[%c0, %c0_6] : memref<128x128xbf16, #tpu.memory_space<vmem>>, vector<128x128xbf16>
    %c0_7 = arith.constant 0 : index
    %c0_8 = arith.constant 0 : index
    %14 = vector.load %arg7[%c0_7, %c0_8] : memref<128x128xbf16, #tpu.memory_space<vmem>>, vector<128x128xbf16>
    %cst = arith.constant dense<0.000000e+00> : vector<128x128xf32>
    %15 = tpu.matmul %13, %14, %cst {dimension_numbers = #tpu.dot_dimension_numbers<[1], [0], [0], [1], [0, 0, 1, 1], [], []>} : vector<128x128xbf16>, vector<128x128xbf16>, vector<128x128xf32> -> vector<128x128xf32>
    %c128_i32_9 = arith.constant 128 : i32
    %16 = arith.muli %arg0, %c128_i32_9 : i32
    %17 = tpu.assume_multiple %16, 128 : i32
    %18 = tpu.iota {dimensions = array<i32: 1>} : vector<1x128xi32>
    %19 = vector.broadcast %17 : i32 to vector<1x128xi32>
    %20 = arith.addi %18, %19 : vector<1x128xi32>
    %c8_i32 = arith.constant 8 : i32
    %21 = vector.broadcast %c8_i32 : i32 to vector<1x128xi32>
    %22 = arith.cmpi slt, %20, %21 : vector<1x128xi32>
    %23 = tpu.iota {dimensions = array<i32: 0>} : vector<128x1xi32>
    %24 = vector.broadcast %9 : i32 to vector<128x1xi32>
    %25 = arith.addi %23, %24 : vector<128x1xi32>
    %c8_i32_10 = arith.constant 8 : i32
    %26 = vector.broadcast %c8_i32_10 : i32 to vector<128x1xi32>
    %27 = arith.cmpi slt, %25, %26 : vector<128x1xi32>
    %cst_11 = arith.constant 0.000000e+00 : f32
    %cst_12 = arith.constant -1.000000e+30 : f32
    %28 = vector.broadcast %cst_11 : f32 to vector<1x128xf32>
    %29 = vector.broadcast %cst_12 : f32 to vector<1x128xf32>
    %30 = arith.select %22, %28, %29 : vector<1x128xi1>, vector<1x128xf32>
    %31 = vector.broadcast %30 : vector<1x128xf32> to vector<128x128xf32>
    %32 = arith.addf %15, %31 : vector<128x128xf32>
    %cst_13 = arith.constant 0.000000e+00 : f32
    %cst_14 = arith.constant -1.000000e+30 : f32
    %33 = vector.broadcast %cst_13 : f32 to vector<128x1xf32>
    %34 = vector.broadcast %cst_14 : f32 to vector<128x1xf32>
    %35 = arith.select %27, %33, %34 : vector<128x1xi1>, vector<128x1xf32>
    %36 = vector.broadcast %35 : vector<128x1xf32> to vector<128x128xf32>
    %37 = arith.addf %32, %36 : vector<128x128xf32>
    %38 = arith.index_cast %9 : i32 to index
    %c0_15 = arith.constant 0 : index
    %39 = vector.load %arg8[%38, %c0_15] : memref<128x1xf32, #tpu.memory_space<vmem>>, vector<128x1xf32>
    %40 = arith.index_cast %9 : i32 to index
    %c0_16 = arith.constant 0 : index
    %41 = vector.load %arg9[%40, %c0_16] : memref<128x1xf32, #tpu.memory_space<vmem>>, vector<128x1xf32>
    %cst_17 = arith.constant dense<0xFF800000> : vector<128xf32>
    %42 = vector.multi_reduction <maximumf>, %37, %cst_17 [1] : vector<128x128xf32> to vector<128xf32>
    %43 = vector.shape_cast %42 : vector<128xf32> to vector<128x1xf32>
    %44 = arith.maximumf %39, %43 : vector<128x1xf32>
    %45 = vector.broadcast %44 : vector<128x1xf32> to vector<128x128xf32>
    %46 = arith.subf %37, %45 : vector<128x128xf32>
    %47 = math.exp %46 : vector<128x128xf32>
    %48 = arith.subf %39, %44 : vector<128x1xf32>
    %49 = math.exp %48 : vector<128x1xf32>
    %50 = arith.mulf %49, %41 : vector<128x1xf32>
    %cst_18 = arith.constant dense<0.000000e+00> : vector<128xf32>
    %51 = vector.multi_reduction <add>, %47, %cst_18 [1] : vector<128x128xf32> to vector<128xf32>
    %52 = vector.shape_cast %51 : vector<128xf32> to vector<128x1xf32>
    %53 = arith.addf %50, %52 : vector<128x1xf32>
    %54 = arith.index_cast %9 : i32 to index
    %c0_19 = arith.constant 0 : index
    %55 = vector.load %arg8[%54, %c0_19] : memref<128x1xf32, #tpu.memory_space<vmem>>, vector<128x1xf32>
    tpu.vector_store %arg8[%54, %c0_19], %44 {strides = array<i32>} : memref<128x1xf32, #tpu.memory_space<vmem>>, vector<128x1xf32>,
    %56 = arith.index_cast %9 : i32 to index
    %c0_20 = arith.constant 0 : index
    %57 = vector.load %arg9[%56, %c0_20] : memref<128x1xf32, #tpu.memory_space<vmem>>, vector<128x1xf32>
    tpu.vector_store %arg9[%56, %c0_20], %53 {strides = array<i32>} : memref<128x1xf32, #tpu.memory_space<vmem>>, vector<128x1xf32>,
    %c0_21 = arith.constant 0 : index
    %c0_22 = arith.constant 0 : index
    %58 = vector.load %arg10[%c0_21, %c0_22] : memref<1x128xf32, #tpu.memory_space<vmem>>, vector<1x128xf32>
    %c0_23 = arith.constant 0 : index
    %c0_24 = arith.constant 0 : index
    %59 = vector.load %arg11[%c0_23, %c0_24] : memref<1x128xf32, #tpu.memory_space<vmem>>, vector<1x128xf32>
    %cst_25 = arith.constant dense<0xFF800000> : vector<1xf32>
    %60 = vector.multi_reduction <maximumf>, %44, %cst_25 [0] : vector<128x1xf32> to vector<1xf32>
    %61 = vector.shape_cast %60 : vector<1xf32> to vector<1x1xf32>
    %62 = vector.broadcast %61 : vector<1x1xf32> to vector<128x1xf32>
    %63 = arith.subf %44, %62 : vector<128x1xf32>
    %64 = math.exp %63 : vector<128x1xf32>
    %65 = vector.broadcast %64 : vector<128x1xf32> to vector<128x128xf32>
    %66 = arith.mulf %47, %65 : vector<128x128xf32>
    %cst_26 = arith.constant dense<0.000000e+00> : vector<128xf32>
    %67 = vector.multi_reduction <add>, %66, %cst_26 [0] : vector<128x128xf32> to vector<128xf32>
    %68 = vector.shape_cast %67 : vector<128xf32> to vector<1x128xf32>
    %69 = vector.broadcast %61 : vector<1x1xf32> to vector<1x128xf32>
    %70 = arith.maximumf %58, %69 : vector<1x128xf32>
    %71 = arith.subf %58, %70 : vector<1x128xf32>
    %72 = math.exp %71 : vector<1x128xf32>
    %73 = arith.mulf %72, %59 : vector<1x128xf32>
    %74 = vector.broadcast %61 : vector<1x1xf32> to vector<1x128xf32>
    %75 = arith.subf %74, %70 : vector<1x128xf32>
    %76 = math.exp %75 : vector<1x128xf32>
    %77 = arith.mulf %68, %76 : vector<1x128xf32>
    %78 = arith.addf %73, %77 : vector<1x128xf32>
    %c0_27 = arith.constant 0 : index
    %c0_28 = arith.constant 0 : index
    %79 = vector.load %arg10[%c0_27, %c0_28] : memref<1x128xf32, #tpu.memory_space<vmem>>, vector<1x128xf32>
    tpu.vector_store %arg10[%c0_27, %c0_28], %70 {strides = array<i32>} : memref<1x128xf32, #tpu.memory_space<vmem>>, vector<1x128xf32>,
    %c0_29 = arith.constant 0 : index
    %c0_30 = arith.constant 0 : index
    %80 = vector.load %arg11[%c0_29, %c0_30] : memref<1x128xf32, #tpu.memory_space<vmem>>, vector<1x128xf32>
    tpu.vector_store %arg11[%c0_29, %c0_30], %78 {strides = array<i32>} : memref<1x128xf32, #tpu.memory_space<vmem>>, vector<1x128xf32>,
    %81 = arith.cmpi eq, %arg1, %arg0 : i32
    %82 = arith.extui %81 : i1 to i32
    %c0_i32_31 = arith.constant 0 : i32
    %83 = arith.cmpi ne, %82, %c0_i32_31 : i32
    scf.if %83 {
      %95 = tpu.iota {dimensions = array<i32: 0>} : vector<128x128xi32>
      %96 = tpu.iota {dimensions = array<i32: 1>} : vector<128x128xi32>
      %97 = arith.cmpi eq, %95, %96 : vector<128x128xi32>
      %cst_39 = arith.constant 0.000000e+00 : f32
      %98 = vector.broadcast %cst_39 : f32 to vector<128x128xf32>
      %99 = arith.select %97, %37, %98 : vector<128x128xi1>, vector<128x128xf32>
      %cst_40 = arith.constant dense<0.000000e+00> : vector<128xf32>
      %100 = vector.multi_reduction <add>, %99, %cst_40 [1] : vector<128x128xf32> to vector<128xf32>
      %101 = vector.shape_cast %100 : vector<128xf32> to vector<128x1xf32>
      %102 = tpu.iota {dimensions = array<i32: 0>} : vector<128x1xi32>
      %103 = vector.broadcast %9 : i32 to vector<128x1xi32>
      %104 = arith.addi %102, %103 : vector<128x1xi32>
      %c8_i32_41 = arith.constant 8 : i32
      %105 = vector.broadcast %c8_i32_41 : i32 to vector<128x1xi32>
      %106 = arith.cmpi slt, %104, %105 : vector<128x1xi32>
      %cst_42 = arith.constant 0.000000e+00 : f32
      %107 = vector.broadcast %cst_42 : f32 to vector<128x1xf32>
      %108 = arith.select %106, %101, %107 : vector<128x1xi1>, vector<128x1xf32>
      %c0_43 = arith.constant 0 : index
      %c0_44 = arith.constant 0 : index
      %109 = vector.load %arg14[%c0_43, %c0_44] : memref<1x1xf32, #tpu.memory_space<vmem>>, vector<1x1xf32>
      %cst_45 = arith.constant dense<0.000000e+00> : vector<1xf32>
      %110 = vector.multi_reduction <add>, %108, %cst_45 [0] : vector<128x1xf32> to vector<1xf32>
      %111 = vector.shape_cast %110 : vector<1xf32> to vector<1x1xf32>
      %112 = arith.addf %109, %111 : vector<1x1xf32>
      %c0_46 = arith.constant 0 : index
      %c0_47 = arith.constant 0 : index
      %113 = vector.load %arg14[%c0_46, %c0_47] : memref<1x1xf32, #tpu.memory_space<vmem>>, vector<1x1xf32>
      tpu.vector_store %arg14[%c0_46, %c0_47], %112 {strides = array<i32>} : memref<1x1xf32, #tpu.memory_space<vmem>>, vector<1x1xf32>,
    } else {
    }
    %c0_i32_32 = arith.constant 0 : i32
    %84 = arith.cmpi eq, %arg0, %c0_i32_32 : i32
    %85 = arith.extui %84 : i1 to i32
    %c0_i32_33 = arith.constant 0 : i32
    %86 = arith.cmpi ne, %85, %c0_i32_33 : i32
    scf.if %86 {
      %95 = math.log %53 : vector<128x1xf32>
      %96 = arith.addf %44, %95 : vector<128x1xf32>
      %97 = tpu.iota {dimensions = array<i32: 0>} : vector<128x1xi32>
      %98 = vector.broadcast %9 : i32 to vector<128x1xi32>
      %99 = arith.addi %97, %98 : vector<128x1xi32>
      %c8_i32_39 = arith.constant 8 : i32
      %100 = vector.broadcast %c8_i32_39 : i32 to vector<128x1xi32>
      %101 = arith.cmpi slt, %99, %100 : vector<128x1xi32>
      %cst_40 = arith.constant 0.000000e+00 : f32
      %102 = vector.broadcast %cst_40 : f32 to vector<128x1xf32>
      %103 = arith.select %101, %96, %102 : vector<128x1xi1>, vector<128x1xf32>
      %c0_41 = arith.constant 0 : index
      %c0_42 = arith.constant 0 : index
      %104 = vector.load %arg12[%c0_41, %c0_42] : memref<1x1xf32, #tpu.memory_space<vmem>>, vector<1x1xf32>
      %cst_43 = arith.constant dense<0.000000e+00> : vector<1xf32>
      %105 = vector.multi_reduction <add>, %103, %cst_43 [0] : vector<128x1xf32> to vector<1xf32>
      %106 = vector.shape_cast %105 : vector<1xf32> to vector<1x1xf32>
      %107 = arith.addf %104, %106 : vector<1x1xf32>
      %c0_44 = arith.constant 0 : index
      %c0_45 = arith.constant 0 : index
      %108 = vector.load %arg12[%c0_44, %c0_45] : memref<1x1xf32, #tpu.memory_space<vmem>>, vector<1x1xf32>
      tpu.vector_store %arg12[%c0_44, %c0_45], %107 {strides = array<i32>} : memref<1x1xf32, #tpu.memory_space<vmem>>, vector<1x1xf32>,
    } else {
    }
    %c0_i32_34 = arith.constant 0 : i32
    %87 = arith.cmpi eq, %arg1, %c0_i32_34 : i32
    %88 = arith.extui %87 : i1 to i32
    %c0_i32_35 = arith.constant 0 : i32
    %89 = arith.cmpi ne, %88, %c0_i32_35 : i32
    scf.if %89 {
      %95 = math.log %78 : vector<1x128xf32>
      %96 = arith.addf %70, %95 : vector<1x128xf32>
      %c128_i32_39 = arith.constant 128 : i32
      %97 = arith.muli %arg0, %c128_i32_39 : i32
      %98 = tpu.assume_multiple %97, 128 : i32
      %99 = tpu.iota {dimensions = array<i32: 1>} : vector<1x128xi32>
      %100 = vector.broadcast %98 : i32 to vector<1x128xi32>
      %101 = arith.addi %99, %100 : vector<1x128xi32>
      %c8_i32_40 = arith.constant 8 : i32
      %102 = vector.broadcast %c8_i32_40 : i32 to vector<1x128xi32>
      %103 = arith.cmpi slt, %101, %102 : vector<1x128xi32>
      %cst_41 = arith.constant 0.000000e+00 : f32
      %104 = vector.broadcast %cst_41 : f32 to vector<1x128xf32>
      %105 = arith.select %103, %96, %104 : vector<1x128xi1>, vector<1x128xf32>
      %c0_42 = arith.constant 0 : index
      %c0_43 = arith.constant 0 : index
      %106 = vector.load %arg13[%c0_42, %c0_43] : memref<1x1xf32, #tpu.memory_space<vmem>>, vector<1x1xf32>
      %cst_44 = arith.constant dense<0.000000e+00> : vector<1xf32>
      %107 = vector.multi_reduction <add>, %105, %cst_44 [1] : vector<1x128xf32> to vector<1xf32>
      %108 = vector.shape_cast %107 : vector<1xf32> to vector<1x1xf32>
      %109 = arith.addf %106, %108 : vector<1x1xf32>
      %c0_45 = arith.constant 0 : index
      %c0_46 = arith.constant 0 : index
      %110 = vector.load %arg13[%c0_45, %c0_46] : memref<1x1xf32, #tpu.memory_space<vmem>>, vector<1x1xf32>
      tpu.vector_store %arg13[%c0_45, %c0_46], %109 {strides = array<i32>} : memref<1x1xf32, #tpu.memory_space<vmem>>, vector<1x1xf32>,
    } else {
    }
    %c0_i32_36 = arith.constant 0 : i32
    %90 = arith.cmpi eq, %arg0, %c0_i32_36 : i32
    %c0_i32_37 = arith.constant 0 : i32
    %91 = arith.cmpi eq, %arg1, %c0_i32_37 : i32
    %92 = arith.andi %90, %91 : i1
    %93 = arith.extui %92 : i1 to i32
    %c0_i32_38 = arith.constant 0 : i32
    %94 = arith.cmpi ne, %93, %c0_i32_38 : i32
    scf.if %94 {
      %c0_39 = arith.constant 0 : index
      %c0_40 = arith.constant 0 : index
      %95 = vector.load %arg12[%c0_39, %c0_40] : memref<1x1xf32, #tpu.memory_space<vmem>>, vector<1x1xf32>
      %c0_41 = arith.constant 0 : index
      %c0_42 = arith.constant 0 : index
      %96 = vector.load %arg14[%c0_41, %c0_42] : memref<1x1xf32, #tpu.memory_space<vmem>>, vector<1x1xf32>
      %97 = arith.subf %95, %96 : vector<1x1xf32>
      %cst_43 = arith.constant 1.250000e-01 : f32
      %98 = vector.broadcast %cst_43 : f32 to vector<1x1xf32>
      %99 = arith.mulf %97, %98 : vector<1x1xf32>
      %c0_44 = arith.constant 0 : index
      %c0_45 = arith.constant 0 : index
      %100 = vector.load %arg13[%c0_44, %c0_45] : memref<1x1xf32, #tpu.memory_space<vmem>>, vector<1x1xf32>
      %c0_46 = arith.constant 0 : index
      %c0_47 = arith.constant 0 : index
      %101 = vector.load %arg14[%c0_46, %c0_47] : memref<1x1xf32, #tpu.memory_space<vmem>>, vector<1x1xf32>
      %102 = arith.subf %100, %101 : vector<1x1xf32>
      %cst_48 = arith.constant 1.250000e-01 : f32
      %103 = vector.broadcast %cst_48 : f32 to vector<1x1xf32>
      %104 = arith.mulf %102, %103 : vector<1x1xf32>
      %105 = arith.addf %99, %104 : vector<1x1xf32>
      %cst_49 = arith.constant 5.000000e-01 : f32
      %106 = vector.broadcast %cst_49 : f32 to vector<1x1xf32>
      %107 = arith.mulf %106, %105 : vector<1x1xf32>
      %c0_50 = arith.constant 0 : index
      %c0_51 = arith.constant 0 : index
      %108 = vector.load %arg4[%c0_50, %c0_51] : memref<1x1xf32, #tpu.memory_space<vmem>>, vector<1x1xf32>
      tpu.vector_store %arg4[%c0_50, %c0_51], %107 {strides = array<i32>} : memref<1x1xf32, #tpu.memory_space<vmem>>, vector<1x1xf32>,
      %c0_52 = arith.constant 0 : index
      %c0_53 = arith.constant 0 : index
      %109 = vector.load %arg5[%c0_52, %c0_53] : memref<1x1xf32, #tpu.memory_space<vmem>>, vector<1x1xf32>
      tpu.vector_store %arg5[%c0_52, %c0_53], %99 {strides = array<i32>} : memref<1x1xf32, #tpu.memory_space<vmem>>, vector<1x1xf32>,
      %c0_54 = arith.constant 0 : index
      %c0_55 = arith.constant 0 : index
      %110 = vector.load %arg6[%c0_54, %c0_55] : memref<1x1xf32, #tpu.memory_space<vmem>>, vector<1x1xf32>
      tpu.vector_store %arg6[%c0_54, %c0_55], %104 {strides = array<i32>} : memref<1x1xf32, #tpu.memory_space<vmem>>, vector<1x1xf32>,
    } else {
    }
    return
  }
  func.func @transform_0(%arg0: i32, %arg1: i32) -> (i32, i32) {
    %c0_i32 = arith.constant 0 : i32
    %c0_i32_0 = arith.constant 0 : i32
    return %arg1, %c0_i32 : i32, i32
  }
  func.func @transform_1(%arg0: i32, %arg1: i32) -> (i32, i32) {
    %c0_i32 = arith.constant 0 : i32
    %c0_i32_0 = arith.constant 0 : i32
    return %c0_i32, %arg0 : i32, i32
  }
  func.func @transform_2(%arg0: i32, %arg1: i32) -> (i32, i32) {
    %c0_i32 = arith.constant 0 : i32
    %c0_i32_0 = arith.constant 0 : i32
    %c0_i32_1 = arith.constant 0 : i32
    return %c0_i32, %c0_i32_0 : i32, i32
  }
  func.func @transform_3(%arg0: i32, %arg1: i32) -> (i32, i32) {
    %c0_i32 = arith.constant 0 : i32
    %c0_i32_0 = arith.constant 0 : i32
    %c0_i32_1 = arith.constant 0 : i32
    return %c0_i32, %c0_i32_0 : i32, i32
  }
  func.func @transform_4(%arg0: i32, %arg1: i32) -> (i32, i32) {
    %c0_i32 = arith.constant 0 : i32
    %c0_i32_0 = arith.constant 0 : i32
    %c0_i32_1 = arith.constant 0 : i32
    return %c0_i32, %c0_i32_0 : i32, i32
  }
}

</mosaic_0001>

<bundles_post_ra>
// kernel: tpu_custom_call.1
= control target key start
LH: loop header
LB: loop body
LE: loop exit
PB: predicated region body
PF: predicated region fallthrough
CT: control target
= control target key end

     0   :  { %10 = vsyncpa [#allocation11], 0  ;;  %s2304_s0 = inlined_call_operand.hbm [shape: bf16[128,128], index: 0, kind: input, shape index: {}]   ;;  %s2305_s1 = inlined_call_operand.hbm [shape: f32[128,128], index: 1, kind: input, shape index: {}]   ;;  %s2306_s2 = inlined_call_operand.hbm [shape: f32[1,1], index: 2, kind: output, shape index: {0}]   ;;  %s2307_s3 = inlined_call_operand.hbm [shape: f32[1,1], index: 3, kind: output, shape index: {1}]   ;;  %s2308_s4 = inlined_call_operand.hbm [shape: f32[1,1], index: 4, kind: output, shape index: {2}]  }
   0x1   :  { %11 = vsyncpa [#allocation14], 0 }
   0x2   :  { %12 = vsyncpa [#allocation12], 0 }
   0x3   :  { %13 = vsyncpa [#allocation17], 0  ;;  %s18_s17 = sshll.u32 %s2304_s0, 4  ;;  %s1753_s18 = smov [#allocation10]   ;;  %s19_s17 = int_to_ptr.hbm [resolvable:$true] %s18_s17 }
   0x4   :  { %s20_s19 = sshll.u32 %s1753_s18, 4  ;;  %s31_s22 = sshll.u32 %s2305_s1, 4  ;;  %s21_s19 = int_to_ptr.vmem [resolvable:$true] %s20_s19  ;;  %s32_s22 = int_to_ptr.hbm [resolvable:$true] %s31_s22 }
   0x5   :  { %s1754_s23 = smov 64   ;;  %s1755_s24 = smov 4  }
   0x6   :  { %26 = dma.hbm_to_vmem [thread:$0]  %s19_s17, 1024, %s21_s19, [#allocation11], %s1754_s23, %s1754_s23, %s1755_s24  }
   0x7   :  { %s1756_s25 = smov [#allocation13]   ;;  %s1757_s27 = smov 128  }
   0x8   :  { %s33_s26 = sshll.u32 %s1756_s25, 4  ;;  %s1758_s28 = smov 8   ;;  %s34_s26 = int_to_ptr.vmem [resolvable:$true] %s33_s26 }
   0x9   :  { %39 = dma.hbm_to_vmem [thread:$0]  %s32_s22, 2048, %s34_s26, [#allocation14], %s1757_s27, %s1757_s27, %s1758_s28  }
   0xa   :  { %1745 = dma.done.wait [#allocation11], 1024  }
   0xb   :  { %1746 = vsyncadd [#allocation11], 4294966272 }
   0xc   :  { %1747 = dma.done.wait [#allocation14], 2048  }
   0xd   :  { %1748 = vsyncadd [#allocation14], 4294965248  ;;  %v1797_v0 = vld [vmem:[#allocation13] sm:$0xff]  ;;  %v1799_v1 = vld [vmem:[#allocation13 + $0x8] sm:$0xff]  ;;  %vm180_vm4 = vcmask 7168   ;;  %vm54_vm6 = vcmask 0  }
   0xe   :  { %v1801_v2 = vld [vmem:[#allocation13 + $0x10] sm:$0xff]  ;;  %v1803_v3 = vld [vmem:[#allocation13 + $0x18] sm:$0xff]  ;;  %v77_v4 = vmul.f32 %v1797_v0, %v1797_v0  ;;  %v78_v5 = vmul.f32 %v1799_v1, %v1799_v1  ;;  %v1811_v7 = vld [vmem:[#allocation13 + $0x20] sm:$0xff]  ;;  %vm1281_vm7 = vcmask 1040384   ;;  %s1763_s0 = smov [#allocation16]   ;;  %s1321_s5 = sshll.u32 %s2307_s3, 4  ;;  %s1322_s5 = int_to_ptr.hbm [resolvable:$true] %s1321_s5 }
   0xf   :  { %v79_v6 = vmul.f32 %v1801_v2, %v1801_v2  ;;  %v80_v8 = vmul.f32 %v1803_v3, %v1803_v3  ;;  %v1815_v10 = vld [vmem:[#allocation13 + $0x28] sm:$0xff]  ;;  %v81_v11 = vmul.f32 %v1811_v7, %v1811_v7  ;;  %v67_v13 = vld [vmem:[#allocation13 + $0x30] sm:$0xff]  ;;  %v68_v16 = vld [vmem:[#allocation13 + $0x38] sm:$0xff]  ;;  %s1319_s1 = sshll.u32 %s1763_s0, 4  ;;  %s1764_s3 = smov [#allocation18]   ;;  %s1320_s1 = int_to_ptr.vmem [resolvable:$true] %s1319_s1 }
  0x10   :  { %v93_v9 = vadd.f32 %v78_v5, %v77_v4  ;;  %v82_v14 = vmul.f32 %v1815_v10, %v1815_v10  ;;  %v83_v17 = vmul.f32 %v67_v13, %v67_v13  ;;  %v69_v19 = vld [vmem:[#allocation13 + $0x40] sm:$0xff]  ;;  %v84_v20 = vmul.f32 %v68_v16, %v68_v16  ;;  %v70_v22 = vld [vmem:[#allocation13 + $0x48] sm:$0xff]  ;;  %v71_v25 = vld [vmem:[#allocation13 + $0x50] sm:$0xff]  ;;  %s1330_s6 = sshll.u32 %s1764_s3, 4  ;;  %s1332_s9 = sshll.u32 %s2308_s4, 4  ;;  %s1331_s6 = int_to_ptr.vmem [resolvable:$true] %s1330_s6  ;;  %s1333_s9 = int_to_ptr.hbm [resolvable:$true] %s1332_s9 }
  0x11   :  { %v85_v23 = vmul.f32 %v69_v19, %v69_v19  ;;  %v86_v26 = vmul.f32 %v70_v22, %v70_v22  ;;  %v72_v28 = vld [vmem:[#allocation13 + $0x58] sm:$0xff]  ;;  %v87_v29 = vmul.f32 %v71_v25, %v71_v25  ;;  %v73_v31 = vld [vmem:[#allocation13 + $0x60] sm:$0xff]  ;;  %v74_v34 = vld [vmem:[#allocation13 + $0x68] sm:$0xff]  ;;  %s1765_s10 = smov [#allocation15]   ;;  %s1310_s14 = sshll.u32 %s2306_s2, 4  ;;  %s1311_s14 = int_to_ptr.hbm [resolvable:$true] %s1310_s14 }
  0x12   :  { %v94_v12 = vadd.f32 %v93_v9, %v79_v6  ;;  %v88_v32 = vmul.f32 %v72_v28, %v72_v28  ;;  %v89_v35 = vmul.f32 %v73_v31, %v73_v31  ;;  %v75_v37 = vld [vmem:[#allocation13 + $0x70] sm:$0xff]  ;;  %v90_v38 = vmul.f32 %v74_v34, %v74_v34  ;;  %v76_v40 = vld [vmem:[#allocation13 + $0x78] sm:$0xff]  ;;  %s1308_s11 = sshll.u32 %s1765_s10, 4  ;;  %s1309_s11 = int_to_ptr.vmem [resolvable:$true] %s1308_s11 }
  0x13   :  { %v91_v41 = vmul.f32 %v75_v37, %v75_v37  ;;  %v92_v43 = vmul.f32 %v76_v40, %v76_v40 }
  0x14   :  { %v95_v15 = vadd.f32 %v94_v12, %v80_v8 }
  0x16   :  { %v96_v18 = vadd.f32 %v95_v15, %v81_v11 }
  0x18   :  { %v97_v21 = vadd.f32 %v96_v18, %v82_v14 }
  0x1a   :  { %v98_v24 = vadd.f32 %v97_v21, %v83_v17 }
  0x1c   :  { %v99_v27 = vadd.f32 %v98_v24, %v84_v20 }
  0x1e   :  { %v100_v30 = vadd.f32 %v99_v27, %v85_v23 }
  0x20   :  { %v101_v33 = vadd.f32 %v100_v30, %v86_v26  ;;  %v1418_v30 = vld [vmem:[#allocation10 + $0x10] sm:$0xff] }
  0x22   :  { %v102_v36 = vadd.f32 %v101_v33, %v87_v29  ;;  %v1416_v29 = vld [vmem:[#allocation10] sm:$0xff]  ;;  %v1417_v33 = vld [vmem:[#allocation10 + $0x8] sm:$0xff] }
  0x24   :  { %v103_v39 = vadd.f32 %v102_v36, %v88_v32  ;;  %v1422_v32 = vld [vmem:[#allocation10 + $0x30] sm:$0xff]  ;;  %v1423_v36 = vld [vmem:[#allocation10 + $0x38] sm:$0xff] }
  0x26   :  { %v104_v42 = vadd.f32 %v103_v39, %v89_v35  ;;  %v1421_v35 = vld [vmem:[#allocation10 + $0x28] sm:$0xff]  ;;  %v1759_v39 = vmov -1e+30  }
  0x28   :  { %v105_v44 = vadd.f32 %v104_v42, %v90_v38 }
  0x2a   :  { %v106_v45 = vadd.f32 %v105_v44, %v91_v41 }
  0x2c   :  { %v107_v46 = vadd.f32 %v106_v45, %v92_v43 }
  0x2e   :  { %v108_v47 = vrot.slane %v107_v46, 4 }
  0x30   :  { %v109_v48 = vadd.f32 %v108_v47, %v107_v46 }
  0x32   :  { %v110_v49 = vrot.slane %v109_v48, 2 }
  0x34   :  { %v111_v50 = vadd.f32 %v110_v49, %v109_v48 }
  0x36   :  { %v112_v51 = vrot.slane %v111_v50, 1 }
  0x38   :  { %v113_v52 = vadd.f32 %v112_v51, %v111_v50 }
  0x3a   :  { %v114_v53 = vmax.f32 %v113_v52, 1e-24 }
  0x3c   :  { %1519 = vrsqrt.f32 %v114_v53  ;;  %vm121_vm0 = vweird.f32 %v114_v53 }
  0x42   :  { %v1520_v54 = vpop.eup %1519 }
  0x43   :  { %v116_v55 = vmul.f32 %v1520_v54, %v114_v53  ;;  %vm122_vm1 = vweird.f32 %v1520_v54 }
  0x44   :  { %vm123_vm2 = vmor %vm121_vm0, %vm122_vm1 }
  0x45   :  { %v117_v56 = vmul.f32 %v1520_v54, %v116_v55 }
  0x47   :  { %v118_v57 = vmul.f32 0.5, %v117_v56 }
  0x49   :  { %v119_v58 = vsub.f32 1.5, %v118_v57 }
  0x4b   :  { %v120_v59 = vmul.f32 %v1520_v54, %v119_v58 }
  0x4d   :  { %v124_v60 = vsel %vm123_vm2, %v1520_v54, %v120_v59 }
  0x4e   :  { %v139_v61 = vmul.f32 %v124_v60, %v75_v37  ;;  %v140_v62 = vmul.f32 %v124_v60, %v76_v40  ;;  %v137_v63 = vmul.f32 %v124_v60, %v73_v31  ;;  %v138_v4 = vmul.f32 %v124_v60, %v74_v34  ;;  %v1420_v31 = vld [vmem:[#allocation10 + $0x20] sm:$0xff]  ;;  %v1419_v34 = vld [vmem:[#allocation10 + $0x18] sm:$0xff] }
  0x4f   :  { %v135_v5 = vmul.f32 %v124_v60, %v71_v25  ;;  %v136_v6 = vmul.f32 %v124_v60, %v72_v28  ;;  %v133_v8 = vmul.f32 %v124_v60, %v69_v19  ;;  %v134_v9 = vmul.f32 %v124_v60, %v70_v22 }
  0x50   :  { %v1470_v11 = vpack.c.bf16 %v140_v62, %v139_v61  ;;  %v1465_v12 = vpack.c.bf16 %v138_v4, %v137_v63  ;;  %v131_v14 = vmul.f32 %v124_v60, %v67_v13  ;;  %v132_v15 = vmul.f32 %v124_v60, %v68_v16 }
  0x51   :  { %v1460_v17 = vpack.c.bf16 %v136_v6, %v135_v5  ;;  %v1455_v18 = vpack.c.bf16 %v134_v9, %v133_v8  ;;  %v129_v20 = vmul.f32 %v124_v60, %v1811_v7  ;;  %v130_v21 = vmul.f32 %v124_v60, %v1815_v10 }
  0x52   :  { %1478 = vst [vmem:[#allocation2 + $0x38] sm:$0xff] %v1470_v11   ;;  %v1450_v23 = vpack.c.bf16 %v132_v15, %v131_v14  ;;  %v127_v24 = vmul.f32 %v124_v60, %v1801_v2  ;;  %v128_v26 = vmul.f32 %v124_v60, %v1803_v3  ;;  %v125_v25 = vmul.f32 %v124_v60, %v1797_v0 }
  0x53   :  { %1477 = vst [vmem:[#allocation2 + $0x28] sm:$0xff] %v1465_v12   ;;  %v1445_v19 = vpack.c.bf16 %v130_v21, %v129_v20  ;;  %v126_v22 = vmul.f32 %v124_v60, %v1799_v1  ;;  %v2311_v37 = vlaneseq  ;;  %v1760_v4 = vmov -inf  }
  0x54   :  { %1476 = vst [vmem:[#allocation2 + $0x20] sm:$0xff] %v1460_v17   ;;  %v1440_v13 = vpack.c.bf16 %v128_v26, %v127_v24 }
  0x55   :  { %1475 = vst [vmem:[#allocation2 + $0x8] sm:$0xff] %v1455_v18   ;;  %v1435_v16 = vpack.c.bf16 %v126_v22, %v125_v25  ;;  %v1828_v38 = vand.u32 127, %v2311_v37 }
  0x56   :  { %1474 = vst [vmem:[#allocation2 + $0x10] sm:$0xff] %v1450_v23  }
  0x57   :  { %1473 = vst [vmem:[#allocation2 + $0x18] sm:$0xff] %v1445_v19   ;;  %vm251_vm3 = vcmp.lt.s32.totalorder %v1828_v38, 8 }
  0x58   :  { %1472 = vst [vmem:[#allocation2] sm:$0xff] %v1440_v13   ;;  %v1833_v40 = vsel %vm251_vm3, 0.0, %v1759_v39 }
  0x59   :  { %v1431_v7 = vld [vmem:[#allocation2 + $0x38] sm:$0xff]  ;;  %1436 = vst [vmem:[#allocation2 + $0x30] sm:$0xff] %v1435_v16  }
  0x5a   :  { %399 = vmatpush.bf16.msra.mxu0 %v1431_v7  ;;  %1479 = vmatpush.bf16.msra.mxu1 %v1431_v7  ;;  %v1430_v2 = vld [vmem:[#allocation2 + $0x28] sm:$0xff]  ;;  %181 = vst.msk [vmem:[#allocation3] sm:$0xff] %vm180_vm4, %v1760_v4 }
  0x5b   :  { %1480 = vmatpush.bf16.msra.mxu2 %v1431_v7  ;;  %1481 = vmatpush.bf16.msra.mxu3 %v1431_v7  ;;  %v1429_v0 = vld [vmem:[#allocation2 + $0x20] sm:$0xff]  ;;  %173 = vst [vmem:[#allocation5] sm:$0x1] %v1760_v4 }
  0x5c   :  { %v1428_v1 = vld [vmem:[#allocation2 + $0x8] sm:$0xff]  ;;  %182 = vst.msk [vmem:[#allocation3 + $0x8] sm:$0xff] %vm180_vm4, %v1760_v4 }
  0x5d   :  { %v1427_v3 = vld [vmem:[#allocation2 + $0x10] sm:$0xff]  ;;  %183 = vst.msk [vmem:[#allocation3 + $0x10] sm:$0xff] %vm180_vm4, %v1760_v4 }
  0x5e   :  { %400 = vmatpush.bf16.msra.mxu0 %v1430_v2  ;;  %1482 = vmatpush.bf16.msra.mxu1 %v1430_v2  ;;  %v1426_v10 = vld [vmem:[#allocation2 + $0x18] sm:$0xff]  ;;  %184 = vst.msk [vmem:[#allocation3 + $0x18] sm:$0xff] %vm180_vm4, %v1760_v4 }
  0x5f   :  { %1483 = vmatpush.bf16.msra.mxu2 %v1430_v2  ;;  %1484 = vmatpush.bf16.msra.mxu3 %v1430_v2  ;;  %v1425_v27 = vld [vmem:[#allocation2] sm:$0xff]  ;;  %185 = vst.msk [vmem:[#allocation3 + $0x20] sm:$0xff] %vm180_vm4, %v1760_v4 }
  0x60   :  { %v1424_v28 = vld [vmem:[#allocation2 + $0x30] sm:$0xff]  ;;  %186 = vst.msk [vmem:[#allocation3 + $0x28] sm:$0xff] %vm180_vm4, %v1760_v4 }
  0x61   :  { %187 = vst.msk [vmem:[#allocation3 + $0x30] sm:$0xff] %vm180_vm4, %v1760_v4 }
  0x62   :  { %401 = vmatpush.bf16.msra.mxu0 %v1429_v0  ;;  %1485 = vmatpush.bf16.msra.mxu1 %v1429_v0  ;;  %188 = vst.msk [vmem:[#allocation3 + $0x38] sm:$0xff] %vm180_vm4, %v1760_v4 }
  0x63   :  { %1486 = vmatpush.bf16.msra.mxu2 %v1429_v0  ;;  %1487 = vmatpush.bf16.msra.mxu3 %v1429_v0  ;;  %189 = vst.msk [vmem:[#allocation3 + $0x40] sm:$0xff] %vm180_vm4, %v1760_v4 }
  0x64   :  { %190 = vst.msk [vmem:[#allocation3 + $0x48] sm:$0xff] %vm180_vm4, %v1760_v4 }
  0x65   :  { %191 = vst.msk [vmem:[#allocation3 + $0x50] sm:$0xff] %vm180_vm4, %v1760_v4 }
  0x66   :  { %402 = vmatpush.bf16.msra.mxu0 %v1428_v1  ;;  %1488 = vmatpush.bf16.msra.mxu1 %v1428_v1  ;;  %192 = vst.msk [vmem:[#allocation3 + $0x58] sm:$0xff] %vm180_vm4, %v1760_v4 }
  0x67   :  { %1489 = vmatpush.bf16.msra.mxu2 %v1428_v1  ;;  %1490 = vmatpush.bf16.msra.mxu3 %v1428_v1  ;;  %193 = vst.msk [vmem:[#allocation3 + $0x60] sm:$0xff] %vm180_vm4, %v1760_v4 }
  0x68   :  { %194 = vst.msk [vmem:[#allocation3 + $0x68] sm:$0xff] %vm180_vm4, %v1760_v4 }
  0x69   :  { %195 = vst.msk [vmem:[#allocation3 + $0x70] sm:$0xff] %vm180_vm4, %v1760_v4 }
  0x6a   :  { %403 = vmatpush.bf16.msra.mxu0 %v1427_v3  ;;  %1491 = vmatpush.bf16.msra.mxu1 %v1427_v3  ;;  %196 = vst.msk [vmem:[#allocation3 + $0x78] sm:$0xff] %vm180_vm4, %v1760_v4 }
  0x6b   :  { %1492 = vmatpush.bf16.msra.mxu2 %v1427_v3  ;;  %1493 = vmatpush.bf16.msra.mxu3 %v1427_v3  ;;  %v1761_v3 = vmov 0  }
  0x6c   :  { %1516 = vset.pattern.permute.xlu1 %v1761_v3  ;;  %1517 = vset.pattern.permute.xlu0 %v1761_v3 }
  0x6d   :  { %1518 = vset.pattern.permute.xlu2 %v1761_v3 }
  0x6e   :  { %404 = vmatpush.bf16.msra.mxu0 %v1426_v10  ;;  %1494 = vmatpush.bf16.msra.mxu1 %v1426_v10 }
  0x6f   :  { %1495 = vmatpush.bf16.msra.mxu2 %v1426_v10  ;;  %1496 = vmatpush.bf16.msra.mxu3 %v1426_v10  ;;  %v2309_v10 = vmov 0.0  }
  0x70   :  { %198 = vst.msk [vmem:[#allocation4] sm:$0xff] %vm180_vm4, %v2309_v10 }
  0x71   :  { %174 = vst [vmem:[#allocation6] sm:$0x1] %v2309_v10 }
  0x72   :  { %405 = vmatpush.bf16.msra.mxu0 %v1425_v27  ;;  %1497 = vmatpush.bf16.msra.mxu1 %v1425_v27  ;;  %199 = vst.msk [vmem:[#allocation4 + $0x8] sm:$0xff] %vm180_vm4, %v2309_v10 }
  0x73   :  { %1498 = vmatpush.bf16.msra.mxu2 %v1425_v27  ;;  %1499 = vmatpush.bf16.msra.mxu3 %v1425_v27  ;;  %v1918_v27 = vld [vmem:[#allocation3] sm:$0xff]  ;;  %200 = vst.msk [vmem:[#allocation4 + $0x10] sm:$0xff] %vm180_vm4, %v2309_v10 }
  0x74   :  { %201 = vst.msk [vmem:[#allocation4 + $0x18] sm:$0xff] %vm180_vm4, %v2309_v10 }
  0x75   :  { %202 = vst.msk [vmem:[#allocation4 + $0x20] sm:$0xff] %vm180_vm4, %v2309_v10 }
  0x76   :  { %406 = vmatpush.bf16.msra.mxu0 %v1424_v28  ;;  %1500 = vmatpush.bf16.msra.mxu1 %v1424_v28  ;;  %203 = vst.msk [vmem:[#allocation4 + $0x28] sm:$0xff] %vm180_vm4, %v2309_v10 }
  0x77   :  { %1501 = vmatpush.bf16.msra.mxu2 %v1424_v28  ;;  %1502 = vmatpush.bf16.msra.mxu3 %v1424_v28  ;;  %204 = vst.msk [vmem:[#allocation4 + $0x30] sm:$0xff] %vm180_vm4, %v2309_v10 }
  0x78   :  { %205 = vst.msk [vmem:[#allocation4 + $0x38] sm:$0xff] %vm180_vm4, %v2309_v10 }
  0x79   :  { %407 = vmatmul.bf16.vlgmr.msra.gmra.mxu0 %v1416_v29  ;;  %417 = vmatmul.bf16.vlgmr.msra.gmra.mxu1 %v1418_v30  ;;  %v1924_v29 = vld [vmem:[#allocation3 + $0x20] sm:$0xff]  ;;  %206 = vst.msk [vmem:[#allocation4 + $0x40] sm:$0xff] %vm180_vm4, %v2309_v10 }
  0x7a   :  { %427 = vmatmul.bf16.vlgmr.msra.gmra.mxu2 %v1420_v31  ;;  %437 = vmatmul.bf16.vlgmr.msra.gmra.mxu3 %v1422_v32  ;;  %207 = vst.msk [vmem:[#allocation4 + $0x48] sm:$0xff] %vm180_vm4, %v2309_v10 }
  0x7b   :  { %208 = vst.msk [vmem:[#allocation4 + $0x50] sm:$0xff] %vm180_vm4, %v2309_v10 }
  0x7c   :  { %209 = vst.msk [vmem:[#allocation4 + $0x58] sm:$0xff] %vm180_vm4, %v2309_v10 }
  0x7d   :  { %210 = vst.msk [vmem:[#allocation4 + $0x60] sm:$0xff] %vm180_vm4, %v2309_v10 }
  0x7e   :  { %211 = vst.msk [vmem:[#allocation4 + $0x68] sm:$0xff] %vm180_vm4, %v2309_v10 }
  0x7f   :  { %212 = vst.msk [vmem:[#allocation4 + $0x70] sm:$0xff] %vm180_vm4, %v2309_v10 }
  0x80   :  { %213 = vst.msk [vmem:[#allocation4 + $0x78] sm:$0xff] %vm180_vm4, %v2309_v10 }
  0x89   :  { %412 = vmatmul.bf16.gmra.mxu0 %v1417_v33  ;;  %422 = vmatmul.bf16.gmra.mxu1 %v1419_v34  ;;  %v1947_v33 = vld [vmem:[#allocation3 + $0x60] sm:$0xff] }
  0x8a   :  { %432 = vmatmul.bf16.gmra.mxu2 %v1421_v35  ;;  %442 = vmatmul.bf16.gmra.mxu3 %v1423_v36  ;;  %2318 = vst [vmem:[#allocation23_spill] sm:$0xff] %v1947_v33  ;;  %v1951_v34 = vld [vmem:[#allocation3 + $0x40] sm:$0xff] }
  0x8b   :  { %2319 = vst [vmem:[#allocation24_spill] sm:$0xff] %v1951_v34 }
  0xf6   :  { %v408_v41 = vpop.f32.mrf.mxu0  ;;  %v418_v42 = vpop.f32.mrf.mxu1 }
  0xf7   :  { %v1836_v43 = vadd.f32 %v408_v41, %v1833_v40  ;;  %v419_v44 = vadd.f32 %v418_v42, %v1833_v40  ;;  %v1975_v41 = vld [vmem:[#allocation3 + $0x68] sm:$0xff] }
  0xf8   :  { %2320 = vst [vmem:[#allocation25_spill] sm:$0xff] %v1975_v41  ;;  %v1977_v42 = vld [vmem:[#allocation3 + $0x8] sm:$0xff] }
  0xf9   :  { %v1839_v45 = vadd.f32 -1e+30, %v419_v44  ;;  %514 = vmax.xlane.f32.xlu0 %v1836_v43  ;;  %v1981_v44 = vld [vmem:[#allocation3 + $0x28] sm:$0xff] }
  0xfb   :  { %522 = vmax.xlane.f32.xlu2 %v1839_v45 }
  0xfd   :  { %v428_v46 = vpop.f32.mrf.mxu2  ;;  %v438_v47 = vpop.f32.mrf.mxu3 }
  0xfe   :  { %v429_v48 = vadd.f32 %v428_v46, %v1833_v40  ;;  %v439_v49 = vadd.f32 %v438_v47, %v1833_v40  ;;  %v410_v50 = vpop.f32.mrf.mxu0  ;;  %v420_v53 = vpop.f32.mrf.mxu1 }
  0xff   :  { %v421_v54 = vadd.f32 %v420_v53, %v1833_v40  ;;  %v411_v55 = vadd.f32 %v410_v50, %v1833_v40 }
 0x100   :  { %v1845_v51 = vadd.f32 -1e+30, %v429_v48  ;;  %v1847_v52 = vadd.f32 -1e+30, %v439_v49 }
 0x101   :  { %v1854_v59 = vadd.f32 -1e+30, %v421_v54  ;;  %v1856_v60 = vadd.f32 -1e+30, %v411_v55 }
 0x102   :  { %538 = vmax.xlane.f32.xlu0 %v1847_v52 }
 0x103   :  { %530 = vmax.xlane.f32.xlu2 %v1845_v51 }
 0x105   :  { %v430_v56 = vpop.f32.mrf.mxu2  ;;  %v440_v57 = vpop.f32.mrf.mxu3 }
 0x106   :  { %v441_v58 = vadd.f32 %v440_v57, %v1833_v40  ;;  %v413_v62 = vpop.f32.mrf.mxu0  ;;  %v431_v5 = vadd.f32 %v430_v56, %v1833_v40  ;;  %v423_v12 = vpop.f32.mrf.mxu1  ;;  %v2008_v57 = vld [vmem:[#allocation3 + $0x10] sm:$0xff] }
 0x107   :  { %v414_v63 = vadd.f32 %v413_v62, %v1833_v40  ;;  %v424_v18 = vadd.f32 %v423_v12, %v1833_v40  ;;  %v2012_v62 = vld [vmem:[#allocation3 + $0x70] sm:$0xff] }
 0x108   :  { %v1858_v61 = vadd.f32 -1e+30, %v441_v58  ;;  %v1872_v14 = vadd.f32 -1e+30, %v431_v5  ;;  %v2010_v58 = vld [vmem:[#allocation3 + $0x48] sm:$0xff]  ;;  %2321 = vst [vmem:[#allocation26_spill] sm:$0xff] %v2012_v62 }
 0x109   :  { %v1867_v9 = vadd.f32 -1e+30, %v414_v63  ;;  %v1889_v23 = vadd.f32 -1e+30, %v424_v18 }
 0x10a   :  { %540 = vmax.xlane.f32.xlu1 %v1858_v61  ;;  %516 = vmax.xlane.f32.xlu0 %v1856_v60 }
 0x10b   :  { %524 = vmax.xlane.f32.xlu2 %v1854_v59 }
 0x10d   :  { %v433_v6 = vpop.f32.mrf.mxu2  ;;  %v443_v8 = vpop.f32.mrf.mxu3 }
 0x10e   :  { %v444_v11 = vadd.f32 %v443_v8, %v1833_v40  ;;  %v434_v17 = vadd.f32 %v433_v6, %v1833_v40  ;;  %v415_v25 = vpop.f32.mrf.mxu0  ;;  %v425_v2 = vpop.f32.mrf.mxu1 }
 0x10f   :  { %v416_v13 = vadd.f32 %v415_v25, %v1833_v40  ;;  %v426_v0 = vadd.f32 %v425_v2, %v1833_v40 }
 0x110   :  { %v1874_v15 = vadd.f32 -1e+30, %v444_v11  ;;  %v1887_v21 = vadd.f32 -1e+30, %v434_v17 }
 0x111   :  { %v1907_v7 = vadd.f32 -1e+30, %v416_v13  ;;  %v1912_v1 = vadd.f32 -1e+30, %v426_v0 }
 0x112   :  { %518 = vmax.xlane.f32.xlu1 %v1867_v9  ;;  %532 = vmax.xlane.f32.xlu0 %v1872_v14 }
 0x113   :  { %542 = vmax.xlane.f32.xlu2 %v1874_v15 }
 0x115   :  { %v435_v20 = vpop.f32.mrf.mxu2  ;;  %v445_v26 = vpop.f32.mrf.mxu3 }
 0x116   :  { %v436_v24 = vadd.f32 %v435_v20, %v1833_v40  ;;  %v446_v22 = vadd.f32 %v445_v26, %v1833_v40  ;;  %v2037_v20 = vld [vmem:[#allocation3 + $0x50] sm:$0xff]  ;;  %v2041_v26 = vld [vmem:[#allocation3 + $0x58] sm:$0xff] }
 0x117   :  { %2322 = vst [vmem:[#allocation27_spill] sm:$0xff] %v2041_v26 }
 0x118   :  { %v1895_v19 = vadd.f32 -1e+30, %v436_v24  ;;  %v1905_v16 = vadd.f32 -1e+30, %v446_v22  ;;  %v2039_v24 = vld [vmem:[#allocation3 + $0x30] sm:$0xff] }
 0x11a   :  { %534 = vmax.xlane.f32.xlu1 %v1887_v21  ;;  %526 = vmax.xlane.f32.xlu0 %v1889_v23 }
 0x11b   :  { %536 = vmax.xlane.f32.xlu2 %v1895_v19 }
 0x122   :  { %520 = vmax.xlane.f32.xlu1 %v1907_v7  ;;  %544 = vmax.xlane.f32.xlu0 %v1905_v16 }
 0x12a   :  { %528 = vmax.xlane.f32.xlu1 %v1912_v1 }
 0x16c   :  { %v515_v28 = vpop.xlane.xlu0 %514 }
 0x16d   :  { %v1929_v30 = vmax.f32 %v1918_v27, %v515_v28 }
 0x16e   :  { %v523_v31 = vpop.xlane.xlu2 %522 }
 0x16f   :  { %803 = vst.msk [vmem:[#allocation3] sm:$0xff] %vm180_vm4, %v1929_v30  ;;  %v1938_v32 = vmax.f32 %v1924_v29, %v523_v31  ;;  %564 = vperm.xlu1 %1516, %v1929_v30  }
 0x171   :  { %807 = vst.msk [vmem:[#allocation3 + $0x20] sm:$0xff] %vm180_vm4, %v1938_v32  ;;  %v841_v18 = vsel %vm180_vm4, %v1938_v32, -inf }
 0x175   :  { %v539_v35 = vpop.xlane.xlu0 %538 }
 0x176   :  { %v1958_v36 = vmax.f32 %v1947_v33, %v539_v35  ;;  %v531_v39 = vpop.xlane.xlu2 %530 }
 0x177   :  { %v1963_v40 = vmax.f32 %v1951_v34, %v531_v39  ;;  %584 = vperm.xlu1 %1516, %v1938_v32   ;;  %v2067_v39 = vld [vmem:[#allocation3 + $0x18] sm:$0xff] }
 0x178   :  { %815 = vst.msk [vmem:[#allocation3 + $0x60] sm:$0xff] %vm180_vm4, %v1958_v36  ;;  %624 = vperm.xlu0 %1517, %v1958_v36  }
 0x179   :  { %811 = vst.msk [vmem:[#allocation3 + $0x40] sm:$0xff] %vm180_vm4, %v1963_v40  ;;  %v849_v12 = vsel %vm180_vm4, %v1963_v40, -inf }
 0x17d   :  { %v541_v46 = vpop.xlane.xlu1 %540  ;;  %v517_v47 = vpop.xlane.xlu0 %516 }
 0x17e   :  { %v1986_v48 = vmax.f32 %v1975_v41, %v541_v46  ;;  %v1989_v49 = vmax.f32 %v1977_v42, %v517_v47  ;;  %v525_v50 = vpop.xlane.xlu2 %524  ;;  %v2069_v46 = vld [vmem:[#allocation3 + $0x78] sm:$0xff] }
 0x17f   :  { %v1992_v53 = vmax.f32 %v1981_v44, %v525_v50  ;;  %604 = vperm.xlu1 %1516, %v1963_v40   ;;  %2323 = vst [vmem:[#allocation28_spill] sm:$0xff] %v2069_v46 }
 0x180   :  { %816 = vst.msk [vmem:[#allocation3 + $0x68] sm:$0xff] %vm180_vm4, %v1986_v48  ;;  %569 = vperm.xlu2 %1518, %v1989_v49   ;;  %v838_v35 = vsel %vm180_vm4, %v1989_v49, -inf }
 0x181   :  { %804 = vst.msk [vmem:[#allocation3 + $0x8] sm:$0xff] %vm180_vm4, %v1989_v49 }
 0x182   :  { %808 = vst.msk [vmem:[#allocation3 + $0x28] sm:$0xff] %vm180_vm4, %v1992_v53 }
 0x185   :  { %v519_v63 = vpop.xlane.xlu1 %518  ;;  %v533_v4 = vpop.xlane.xlu0 %532 }
 0x186   :  { %v2015_v5 = vmax.f32 %v2008_v57, %v519_v63  ;;  %v2018_v6 = vmax.f32 %v2010_v58, %v533_v4  ;;  %v543_v8 = vpop.xlane.xlu2 %542 }
 0x187   :  { %v2021_v11 = vmax.f32 %v2012_v62, %v543_v8  ;;  %v857_v62 = vsel %vm180_vm4, %v1958_v36, -inf }
 0x188   :  { %805 = vst.msk [vmem:[#allocation3 + $0x10] sm:$0xff] %vm180_vm4, %v2015_v5  ;;  %589 = vperm.xlu2 %1518, %v1992_v53   ;;  %609 = vperm.xlu0 %1517, %v2018_v6   ;;  %v851_v54 = vsel %vm180_vm4, %v2018_v6, -inf }
 0x189   :  { %812 = vst.msk [vmem:[#allocation3 + $0x48] sm:$0xff] %vm180_vm4, %v2018_v6 }
 0x18a   :  { %817 = vst.msk [vmem:[#allocation3 + $0x70] sm:$0xff] %vm180_vm4, %v2021_v11 }
 0x18d   :  { %v535_v25 = vpop.xlane.xlu1 %534  ;;  %v527_v22 = vpop.xlane.xlu0 %526 }
 0x18e   :  { %v2044_v13 = vmax.f32 %v2037_v20, %v535_v25  ;;  %v2047_v2 = vmax.f32 %v2039_v24, %v527_v22  ;;  %v537_v0 = vpop.xlane.xlu2 %536  ;;  %v843_v22 = vsel %vm180_vm4, %v1992_v53, -inf  ;;  %v839_v25 = vsel %vm180_vm4, %v2015_v5, -inf }
 0x18f   :  { %v2050_v3 = vmax.f32 %v2041_v26, %v537_v0  ;;  %v844_v28 = vmax.f32 %v838_v35, %v843_v22 }
 0x190   :  { %813 = vst.msk [vmem:[#allocation3 + $0x50] sm:$0xff] %vm180_vm4, %v2044_v13  ;;  %629 = vperm.xlu2 %1518, %v1986_v48   ;;  %574 = vperm.xlu0 %1517, %v2015_v5   ;;  %v845_v0 = vsel %vm180_vm4, %v2047_v2, -inf  ;;  %v853_v10 = vsel %vm180_vm4, %v2044_v13, -inf }
 0x191   :  { %809 = vst.msk [vmem:[#allocation3 + $0x30] sm:$0xff] %vm180_vm4, %v2047_v2  ;;  %594 = vperm.xlu1 %1516, %v2047_v2   ;;  %v846_v17 = vmax.f32 %v839_v25, %v845_v0  ;;  %v852_v56 = vmax.f32 %v844_v28, %v851_v54  ;;  %v859_v28 = vsel %vm180_vm4, %v1986_v48, -inf  ;;  %v861_v25 = vsel %vm180_vm4, %v2021_v11, -inf }
 0x192   :  { %814 = vst.msk [vmem:[#allocation3 + $0x58] sm:$0xff] %vm180_vm4, %v2050_v3  ;;  %v855_v22 = vsel %vm180_vm4, %v2050_v3, -inf }
 0x193   :  { %v860_v0 = vmax.f32 %v852_v56, %v859_v28 }
 0x195   :  { %v521_v47 = vpop.xlane.xlu1 %520  ;;  %v545_v50 = vpop.xlane.xlu0 %544 }
 0x196   :  { %v2072_v63 = vmax.f32 %v2067_v39, %v521_v47  ;;  %v2075_v4 = vmax.f32 %v2069_v46, %v545_v50  ;;  %v837_v47 = vsel %vm180_vm4, %v1929_v30, -inf  ;;  %v2094_v50 = vld [vmem:[#allocation3 + $0x38] sm:$0xff] }
 0x197   :  { %v842_v8 = vmax.f32 %v837_v47, %v841_v18  ;;  %v854_v18 = vmax.f32 %v846_v17, %v853_v10 }
 0x198   :  { %806 = vst.msk [vmem:[#allocation3 + $0x18] sm:$0xff] %vm180_vm4, %v2072_v63  ;;  %614 = vperm.xlu2 %1518, %v2044_v13   ;;  %639 = vperm.xlu0 %1517, %v2075_v4   ;;  %v840_v37 = vsel %vm180_vm4, %v2072_v63, -inf  ;;  %v863_v10 = vsel %vm180_vm4, %v2075_v4, -inf }
 0x199   :  { %818 = vst.msk [vmem:[#allocation3 + $0x78] sm:$0xff] %vm180_vm4, %v2075_v4  ;;  %634 = vperm.xlu1 %1516, %v2021_v11  }
 0x19d   :  { %v529_v31 = vpop.xlane.xlu1 %528 }
 0x19e   :  { %v2107_v55 = vmax.f32 %v2094_v50, %v529_v31  ;;  %v850_v31 = vmax.f32 %v842_v8, %v849_v12  ;;  %v862_v12 = vmax.f32 %v854_v18, %v861_v25 }
 0x1a0   :  { %810 = vst.msk [vmem:[#allocation3 + $0x38] sm:$0xff] %vm180_vm4, %v2107_v55  ;;  %v847_v35 = vsel %vm180_vm4, %v2107_v55, -inf  ;;  %579 = vperm.xlu2 %1518, %v2072_v63  }
 0x1a1   :  { %v848_v54 = vmax.f32 %v840_v37, %v847_v35  ;;  %619 = vperm.xlu1 %1516, %v2050_v3   ;;  %v858_v37 = vmax.f32 %v850_v31, %v857_v62 }
 0x1a3   :  { %v856_v47 = vmax.f32 %v848_v54, %v855_v22  ;;  %v865_v8 = vmax.f32 %v858_v37, %v860_v0 }
 0x1a5   :  { %v864_v17 = vmax.f32 %v856_v47, %v863_v10 }
 0x1a7   :  { %v866_v35 = vmax.f32 %v862_v12, %v864_v17 }
 0x1a8   :  { %599 = vperm.xlu2 %1518, %v2107_v55  }
 0x1a9   :  { %v867_v26 = vmax.f32 %v865_v8, %v866_v35 }
 0x1ab   :  { %v868_v34 = vrot.slane %v867_v26, 4 }
 0x1ad   :  { %v869_v46 = vmax.f32 %v867_v26, %v868_v34 }
 0x1af   :  { %v870_v41 = vrot.slane %v869_v46, 2 }
 0x1b1   :  { %v871_v33 = vmax.f32 %v869_v46, %v870_v41 }
 0x1b3   :  { %v872_v56 = vrot.slane %v871_v33, 1 }
 0x1b5   :  { %v2132_v54 = vmax.f32 %v871_v33, %v872_v56 }
 0x1b7   :  { %v876_v28 = vsub.f32 %v2015_v5, %v2132_v54  ;;  %v875_v62 = vsub.f32 %v1989_v49, %v2132_v54  ;;  %v874_v31 = vsub.f32 %v1929_v30, %v2132_v54  ;;  %v880_v34 = vsub.f32 %v2047_v2, %v2132_v54 }
 0x1b8   :  { %v878_v33 = vsub.f32 %v1938_v32, %v2132_v54  ;;  %v877_v41 = vsub.f32 %v2072_v63, %v2132_v54  ;;  %v883_v12 = vsub.f32 %v2018_v6, %v2132_v54  ;;  %v881_v17 = vsub.f32 %v2107_v55, %v2132_v54 }
 0x1b9   :  { %v894_v18 = vmul.f32 1.442695, %v876_v28  ;;  %v892_v25 = vmul.f32 1.442695, %v875_v62  ;;  %v890_v22 = vmul.f32 1.442695, %v874_v31  ;;  %v879_v8 = vsub.f32 %v1992_v53, %v2132_v54 }
 0x1ba   :  { %v902_v26 = vmul.f32 1.442695, %v880_v34  ;;  %v898_v46 = vmul.f32 1.442695, %v878_v33  ;;  %v896_v47 = vmul.f32 1.442695, %v877_v41  ;;  %v882_v34 = vsub.f32 %v1963_v40, %v2132_v54 }
 0x1bb   :  { %1521 = vpow2.f32 %v894_v18  ;;  %v908_v35 = vmul.f32 1.442695, %v883_v12  ;;  %v904_v56 = vmul.f32 1.442695, %v881_v17  ;;  %v900_v62 = vmul.f32 1.442695, %v879_v8 }
 0x1bc   :  { %1523 = vpow2.f32 %v892_v25  ;;  %v886_v25 = vsub.f32 %v1958_v36, %v2132_v54  ;;  %v885_v12 = vsub.f32 %v2050_v3, %v2132_v54 }
 0x1bd   :  { %1525 = vpow2.f32 %v890_v22  ;;  %v884_v22 = vsub.f32 %v2044_v13, %v2132_v54 }
 0x1be   :  { %1527 = vpow2.f32 %v902_v26  ;;  %v914_v33 = vmul.f32 1.442695, %v886_v25 }
 0x1bf   :  { %1529 = vpow2.f32 %v898_v46  ;;  %v910_v41 = vmul.f32 1.442695, %v884_v22  ;;  %v906_v46 = vmul.f32 1.442695, %v882_v34 }
 0x1c0   :  { %1531 = vpow2.f32 %v896_v47 }
 0x1c1   :  { %v1522_v0 = vpop.eup %1521  ;;  %1533 = vpow2.f32 %v908_v35 }
 0x1c2   :  { %v1524_v10 = vpop.eup %1523  ;;  %934 = vperm.xlu2 %1518, %v1522_v0   ;;  %1535 = vpow2.f32 %v904_v56  ;;  %v912_v56 = vmul.f32 1.442695, %v885_v12 }
 0x1c3   :  { %v1526_v37 = vpop.eup %1525  ;;  %929 = vperm.xlu1 %1516, %v1524_v10   ;;  %1537 = vpow2.f32 %v900_v62  ;;  %v889_v10 = vsub.f32 %v2075_v4, %v2132_v54 }
 0x1c4   :  { %924 = vperm.xlu0 %1517, %v1526_v37   ;;  %v1528_v28 = vpop.eup %1527  ;;  %1539 = vpow2.f32 %v914_v33  ;;  %v887_v37 = vsub.f32 %v1986_v48, %v2132_v54 }
 0x1c5   :  { %v1530_v31 = vpop.eup %1529  ;;  %1541 = vpow2.f32 %v910_v41  ;;  %v920_v17 = vmul.f32 1.442695, %v889_v10 }
 0x1c6   :  { %v1532_v18 = vpop.eup %1531  ;;  %1543 = vpow2.f32 %v906_v46  ;;  %v916_v8 = vmul.f32 1.442695, %v887_v37 }
 0x1c7   :  { %v1534_v26 = vpop.eup %1533  ;;  %1545 = vpow2.f32 %v920_v17 }
 0x1c8   :  { %v1536_v0 = vpop.eup %1535  ;;  %1547 = vpow2.f32 %v916_v8 }
 0x1c9   :  { %v1538_v47 = vpop.eup %1537  ;;  %1549 = vpow2.f32 %v912_v56 }
 0x1ca   :  { %954 = vperm.xlu2 %1518, %v1528_v28   ;;  %v1540_v35 = vpop.eup %1539 }
 0x1cb   :  { %944 = vperm.xlu1 %1516, %v1530_v31   ;;  %v1542_v28 = vpop.eup %1541  ;;  %v888_v31 = vsub.f32 %v2021_v11, %v2132_v54 }
 0x1cc   :  { %939 = vperm.xlu0 %1517, %v1532_v18   ;;  %v1544_v62 = vpop.eup %1543 }
 0x1cd   :  { %v1546_v18 = vpop.eup %1545  ;;  %v918_v22 = vmul.f32 1.442695, %v888_v31 }
 0x1ce   :  { %v1548_v34 = vpop.eup %1547 }
 0x1cf   :  { %v1550_v33 = vpop.eup %1549  ;;  %1551 = vpow2.f32 %v918_v22 }
 0x1d2   :  { %969 = vperm.xlu2 %1518, %v1534_v26  }
 0x1d3   :  { %959 = vperm.xlu1 %1516, %v1536_v0  }
 0x1d4   :  { %949 = vperm.xlu0 %1517, %v1538_v47  }
 0x1d5   :  { %v1552_v41 = vpop.eup %1551 }
 0x1da   :  { %984 = vperm.xlu2 %1518, %v1540_v35   ;;  %v570_v25 = vpop.permute.xlu2 %569 }
 0x1db   :  { %974 = vperm.xlu1 %1516, %v1542_v28  }
 0x1dc   :  { %964 = vperm.xlu0 %1517, %v1544_v62  }
 0x1e1   :  { %v565_v0 = vpop.permute.xlu1 %564 }
 0x1e2   :  { %999 = vperm.xlu2 %1518, %v1546_v18   ;;  %v590_v26 = vpop.permute.xlu2 %589  ;;  %v642_v10 = vsub.f32 %v1836_v43, %v565_v0 }
 0x1e3   :  { %989 = vperm.xlu1 %1516, %v1548_v34   ;;  %v647_v35 = vsub.f32 %v1854_v59, %v590_v26 }
 0x1e4   :  { %979 = vperm.xlu0 %1517, %v1550_v33   ;;  %v658_v12 = vmul.f32 1.442695, %v642_v10  ;;  %v643_v33 = vsub.f32 %v1856_v60, %v570_v25 }
 0x1e5   :  { %v668_v28 = vmul.f32 1.442695, %v647_v35 }
 0x1e6   :  { %1553 = vpow2.f32 %v658_v12  ;;  %v660_v10 = vmul.f32 1.442695, %v643_v33 }
 0x1e7   :  { %1555 = vpow2.f32 %v668_v28 }
 0x1e9   :  { %v585_v17 = vpop.permute.xlu1 %584 }
 0x1ea   :  { %v2167_v46 = vpop.permute.xlu2 %629  ;;  %v625_v47 = vpop.permute.xlu0 %624  ;;  %v646_v56 = vsub.f32 %v1839_v45, %v585_v17 }
 0x1eb   :  { %1041 = vperm.xlu1 %1516, %v2132_v54  }
 0x1ec   :  { %994 = vperm.xlu0 %1517, %v1552_v41   ;;  %v2172_v31 = vpop.eup %1553  ;;  %v666_v54 = vmul.f32 1.442695, %v646_v56  ;;  %v2324_v41 = vlaneseq }
 0x1ed   :  { %v2181_v0 = vpop.eup %1555 }
 0x1ee   :  { %1557 = vpow2.f32 %v666_v54  ;;  %v253_v59 = vshrl.u32 %v2324_v41, 7 }
 0x1f0   :  { %vm1060_vm5 = vcmp.eq.s32.totalorder %v253_v59, %v1828_v38 }
 0x1f1   :  { %v2174_v18 = vpop.permute.xlu1 %604  ;;  %v1076_v60 = vsel %vm1060_vm5, %v1836_v43, 0.0 }
 0x1f2   :  { %v615_v37 = vpop.permute.xlu2 %614 }
 0x1f3   :  { %v652_v43 = vsub.f32 %v1887_v21, %v615_v37 }
 0x1f4   :  { %v2185_v35 = vpop.eup %1557 }
 0x1fa   :  { %v610_v8 = vpop.permute.xlu0 %609  ;;  %v580_v62 = vpop.permute.xlu2 %579 }
 0x1fb   :  { %v645_v22 = vsub.f32 %v1907_v7, %v580_v62 }
 0x1fd   :  { %v664_v26 = vmul.f32 1.442695, %v645_v22 }
 0x1ff   :  { %1559 = vpow2.f32 %v664_v26  ;;  %v655_v26 = vsub.f32 %v1858_v61, %v2167_v46 }
 0x200   :  { %1561 = vpow2.f32 %v660_v10 }
 0x202   :  { %v575_v34 = vpop.permute.xlu0 %574  ;;  %v600_v7 = vpop.permute.xlu2 %599 }
 0x203   :  { %v644_v45 = vsub.f32 %v1867_v9, %v575_v34  ;;  %v595_v12 = vpop.permute.xlu1 %594  ;;  %v649_v25 = vsub.f32 %v1912_v1, %v600_v7  ;;  %v651_v34 = vsub.f32 %v1872_v14, %v610_v8  ;;  %v684_v8 = vmul.f32 1.442695, %v655_v26 }
 0x204   :  { %v648_v9 = vsub.f32 %v1889_v23, %v595_v12  ;;  %v678_v23 = vmul.f32 1.442695, %v652_v43 }
 0x205   :  { %v662_v17 = vmul.f32 1.442695, %v644_v45  ;;  %v1560_v56 = vpop.eup %1559  ;;  %v672_v62 = vmul.f32 1.442695, %v649_v25  ;;  %v676_v33 = vmul.f32 1.442695, %v651_v34  ;;  %v654_v45 = vsub.f32 %v1847_v52, %v625_v47 }
 0x206   :  { %v670_v28 = vmul.f32 1.442695, %v648_v9  ;;  %v1562_v54 = vpop.eup %1561 }
 0x207   :  { %1563 = vpow2.f32 %v662_v17  ;;  %v682_v14 = vmul.f32 1.442695, %v654_v45 }
 0x208   :  { %1565 = vpow2.f32 %v670_v28 }
 0x209   :  { %1567 = vpow2.f32 %v672_v62 }
 0x20a   :  { %1569 = vpow2.f32 %v676_v33  ;;  %v640_v10 = vpop.permute.xlu0 %639 }
 0x20b   :  { %754 = vadd.xlane.f32.xlu2 %v2172_v31  ;;  %v2193_v41 = vpop.permute.xlu1 %634  ;;  %1571 = vpow2.f32 %v678_v23  ;;  %v657_v17 = vsub.f32 %v1905_v16, %v640_v10  ;;  %v650_v23 = vsub.f32 %v1845_v51, %v2174_v18 }
 0x20c   :  { %1573 = vpow2.f32 %v682_v14 }
 0x20d   :  { %v1564_v22 = vpop.eup %1563  ;;  %1575 = vpow2.f32 %v684_v8  ;;  %v688_v7 = vmul.f32 1.442695, %v657_v17  ;;  %v674_v8 = vmul.f32 1.442695, %v650_v23 }
 0x20e   :  { %v1566_v1 = vpop.eup %1565 }
 0x20f   :  { %v1568_v59 = vpop.eup %1567  ;;  %1577 = vpow2.f32 %v688_v7 }
 0x210   :  { %v1570_v21 = vpop.eup %1569  ;;  %1579 = vpow2.f32 %v674_v8 }
 0x211   :  { %v1572_v37 = vpop.eup %1571 }
 0x212   :  { %v1574_v52 = vpop.eup %1573 }
 0x213   :  { %764 = vadd.xlane.f32.xlu2 %v2181_v0  ;;  %v620_v12 = vpop.permute.xlu1 %619  ;;  %v1576_v47 = vpop.eup %1575 }
 0x215   :  { %762 = vadd.xlane.f32.xlu1 %v2185_v35  ;;  %v1578_v28 = vpop.eup %1577 }
 0x216   :  { %1092 = vadd.xlane.f32.xlu0 %v1076_v60 }
 0x21b   :  { %760 = vadd.xlane.f32.xlu2 %v1560_v56 }
 0x21c   :  { %v935_v61 = vpop.permute.xlu2 %934 }
 0x21d   :  { %756 = vadd.xlane.f32.xlu1 %v1562_v54  ;;  %v1004_v16 = vmul.f32 %v1564_v22, %v935_v61 }
 0x21e   :  { %758 = vadd.xlane.f32.xlu0 %v1564_v22 }
 0x224   :  { %v955_v45 = vpop.permute.xlu2 %954 }
 0x225   :  { %766 = vadd.xlane.f32.xlu1 %v1566_v1 }
 0x226   :  { %768 = vadd.xlane.f32.xlu0 %v1568_v59 }
 0x22d   :  { %772 = vadd.xlane.f32.xlu1 %v1570_v21 }
 0x22e   :  { %774 = vadd.xlane.f32.xlu0 %v1572_v37 }
 0x235   :  { %v930_v60 = vpop.permute.xlu1 %929  ;;  %778 = vadd.xlane.f32.xlu1 %v1574_v52 }
 0x236   :  { %v925_v46 = vpop.permute.xlu0 %924  ;;  %780 = vadd.xlane.f32.xlu0 %v1576_v47  ;;  %v1003_v9 = vmul.f32 %v1562_v54, %v930_v60  ;;  %v653_v60 = vsub.f32 %v1895_v19, %v620_v12 }
 0x237   :  { %v1002_v25 = vmul.f32 %v2172_v31, %v925_v46  ;;  %v1008_v46 = vmul.f32 %v1566_v1, %v955_v45 }
 0x239   :  { %v1018_v62 = vadd.f32 %v1003_v9, %v1002_v25  ;;  %v680_v9 = vmul.f32 1.442695, %v653_v60  ;;  %v2205_v25 = vpop.eup %1579 }
 0x23b   :  { %v1019_v26 = vadd.f32 %v1018_v62, %v1004_v16  ;;  %1581 = vpow2.f32 %v680_v9 }
 0x23d   :  { %v945_v34 = vpop.permute.xlu1 %944  ;;  %784 = vadd.xlane.f32.xlu1 %v1578_v28 }
 0x23e   :  { %v940_v43 = vpop.permute.xlu0 %939  ;;  %v1006_v10 = vmul.f32 %v2185_v35, %v945_v34  ;;  %v2325_v34 = vmov 0.0  }
 0x23f   :  { %v1005_v33 = vmul.f32 %v1560_v56, %v940_v43  ;;  %v970_v56 = vpop.permute.xlu2 %969  ;;  %55 = vst.msk [vmem:[#allocation7] sm:$0x1] %vm54_vm6, %v2325_v34 }
 0x240   :  { %v1011_v19 = vmul.f32 %v1570_v21, %v970_v56  ;;  %56 = vst.msk [vmem:[#allocation8] sm:$0x1] %vm54_vm6, %v2325_v34 }
 0x241   :  { %v1020_v14 = vadd.f32 %v1019_v26, %v1005_v33  ;;  %57 = vst.msk [vmem:[#allocation9] sm:$0x1] %vm54_vm6, %v2325_v34  ;;  %v2216_v45 = vpop.eup %1581  ;;  %v690_v34 = vsub.f32 %v1918_v27, %v1929_v30 }
 0x243   :  { %v1021_v7 = vadd.f32 %v1020_v14, %v1006_v10  ;;  %v835_v10 = vld [vmem:[#allocation5] sm:$0x1] }
 0x245   :  { %v960_v17 = vpop.permute.xlu1 %959 }
 0x246   :  { %v950_v54 = vpop.permute.xlu0 %949  ;;  %v1009_v51 = vmul.f32 %v1568_v59, %v960_v17 }
 0x247   :  { %v1007_v31 = vmul.f32 %v2181_v0, %v950_v54  ;;  %v656_v0 = vsub.f32 %v1874_v15, %v2193_v41  ;;  %v985_v16 = vpop.permute.xlu2 %984 }
 0x248   :  { %v1014_v21 = vmul.f32 %v1574_v52, %v985_v16 }
 0x249   :  { %v1022_v22 = vadd.f32 %v1021_v7, %v1007_v31  ;;  %v686_v12 = vmul.f32 1.442695, %v656_v0 }
 0x24b   :  { %v1023_v61 = vadd.f32 %v1022_v22, %v1008_v46  ;;  %1583 = vpow2.f32 %v686_v12 }
 0x24d   :  { %v975_v18 = vpop.permute.xlu1 %974  ;;  %v1024_v43 = vadd.f32 %v1023_v61, %v1009_v51 }
 0x24e   :  { %v965_v62 = vpop.permute.xlu0 %964  ;;  %v1012_v33 = vmul.f32 %v1572_v37, %v975_v18 }
 0x24f   :  { %v1010_v35 = vmul.f32 %v2205_v25, %v965_v62  ;;  %v1000_v31 = vpop.permute.xlu2 %999 }
 0x250   :  { %v1017_v61 = vmul.f32 %v1578_v28, %v1000_v31  ;;  %v706_v28 = vmul.f32 1.442695, %v690_v34 }
 0x251   :  { %v1025_v1 = vadd.f32 %v1024_v43, %v1010_v35  ;;  %v2219_v7 = vpop.eup %1583 }
 0x253   :  { %v1026_v59 = vadd.f32 %v1025_v1, %v1011_v19 }
 0x255   :  { %v990_v23 = vpop.permute.xlu1 %989  ;;  %v1027_v41 = vadd.f32 %v1026_v59, %v1012_v33  ;;  %v836_v59 = vld [vmem:[#allocation6] sm:$0x1] }
 0x256   :  { %v980_v15 = vpop.permute.xlu0 %979  ;;  %v1015_v17 = vmul.f32 %v1576_v47, %v990_v23 }
 0x257   :  { %v1013_v26 = vmul.f32 %v2216_v45, %v980_v15 }
 0x259   :  { %v1028_v14 = vadd.f32 %v1027_v41, %v1013_v26  ;;  %v694_v41 = vsub.f32 %v1924_v29, %v1938_v32  ;;  %v2326_v26 = vsub.f32 %v1981_v44, %v1992_v53 }
 0x25b   :  { %v1029_v8 = vadd.f32 %v1028_v14, %v1014_v21  ;;  %v716_v21 = vmul.f32 1.442695, %v2326_v26  ;;  %v714_v14 = vmul.f32 1.442695, %v694_v41  ;;  %v500_v41 = vld [vmem:[#allocation4 + $0x10] sm:$0xff] }
 0x25d   :  { %v1042_v54 = vpop.permute.xlu1 %1041  ;;  %v1030_v37 = vadd.f32 %v1029_v8, %v1015_v17  ;;  %v498_v8 = vld [vmem:[#allocation4] sm:$0xff] }
 0x25e   :  { %v1044_v60 = vmax.f32 %v835_v10, %v1042_v54  ;;  %v995_v46 = vpop.permute.xlu0 %994 }
 0x25f   :  { %v1016_v22 = vmul.f32 %v2219_v7, %v995_v46 }
 0x260   :  { %v1045_v56 = vsub.f32 %v835_v10, %v1044_v60  ;;  %1054 = vst [vmem:[#allocation5] sm:$0x1] %v1044_v60  ;;  %v1049_v51 = vsub.f32 %v1042_v54, %v1044_v60 }
 0x261   :  { %v1031_v9 = vadd.f32 %v1030_v37, %v1016_v22  ;;  %v2327_v22 = vsub.f32 %v2067_v39, %v2072_v63  ;;  %v502_v63 = vld [vmem:[#allocation4 + $0x20] sm:$0xff] }
 0x262   :  { %v1046_v52 = vmul.f32 1.442695, %v1045_v56  ;;  %v1050_v43 = vmul.f32 1.442695, %v1049_v51  ;;  %v2328_v56 = vsub.f32 %v1977_v42, %v1989_v49 }
 0x263   :  { %v1032_v18 = vadd.f32 %v1031_v9, %v1017_v61  ;;  %v712_v29 = vmul.f32 1.442695, %v2327_v22  ;;  %v2329_v9 = vsub.f32 %v2008_v57, %v2015_v5  ;;  %v2330_v57 = vsub.f32 %v2039_v24, %v2047_v2 }
 0x264   :  { %1585 = vpow2.f32 %v1046_v52  ;;  %v708_v61 = vmul.f32 1.442695, %v2328_v56  ;;  %v2333_v22 = vsub.f32 %v2037_v20, %v2044_v13 }
 0x265   :  { %v1033_v62 = vrot.slane %v1032_v18, 4  ;;  %1587 = vpow2.f32 %v1050_v43  ;;  %v710_v51 = vmul.f32 1.442695, %v2329_v9  ;;  %v718_v5 = vmul.f32 1.442695, %v2330_v57  ;;  %v2334_v9 = vld [vmem:[#allocation23_spill] sm:$0xff] }
 0x266   :  { %1589 = vpow2.f32 %v706_v28 }
 0x267   :  { %v1034_v35 = vadd.f32 %v1033_v62, %v1032_v18 }
 0x269   :  { %v1035_v47 = vrot.slane %v1034_v35, 2 }
 0x26a   :  { %v1586_v1 = vpop.eup %1585 }
 0x26b   :  { %v1036_v0 = vadd.f32 %v1035_v47, %v1034_v35  ;;  %v1588_v16 = vpop.eup %1587  ;;  %v1048_v33 = vmul.f32 %v1586_v1, %v836_v59  ;;  %v501_v1 = vld [vmem:[#allocation4 + $0x18] sm:$0xff]  ;;  %v2331_v59 = vsub.f32 %v2094_v50, %v2107_v55 }
 0x26c   :  { %v1590_v27 = vpop.eup %1589 }
 0x26d   :  { %v1037_v19 = vrot.slane %v1036_v0, 1  ;;  %v738_v54 = vmul.f32 %v1590_v27, %v498_v8 }
 0x26f   :  { %v1038_v12 = vadd.f32 %v1037_v19, %v1036_v0 }
 0x271   :  { %v1052_v23 = vmul.f32 %v1588_v16, %v1038_v12  ;;  %v720_v12 = vmul.f32 1.442695, %v2331_v59 }
 0x273   :  { %v1053_v15 = vadd.f32 %v1052_v23, %v1048_v33  ;;  %v499_v23 = vld [vmem:[#allocation4 + $0x8] sm:$0xff] }
 0x275   :  { %1591 = vlog2.f32 %v1053_v15  ;;  %1055 = vst [vmem:[#allocation6] sm:$0x1] %v1053_v15 }
 0x276   :  { %1593 = vpow2.f32 %v716_v21 }
 0x277   :  { %1595 = vpow2.f32 %v714_v14 }
 0x27b   :  { %v1592_v10 = vpop.eup %1591 }
 0x27c   :  { %v1277_v17 = vmul.f32 0.6931472, %v1592_v10  ;;  %v1594_v53 = vpop.eup %1593 }
 0x27d   :  { %v1596_v39 = vpop.eup %1595 }
 0x27e   :  { %v755_v31 = vpop.xlane.xlu2 %754  ;;  %v1278_v46 = vadd.f32 %v1277_v17, %v1044_v60  ;;  %v503_v60 = vld [vmem:[#allocation4 + $0x28] sm:$0xff]  ;;  %v742_v43 = vmul.f32 %v1596_v39, %v502_v63 }
 0x27f   :  { %v786_v37 = vadd.f32 %v755_v31, %v738_v54  ;;  %v743_v38 = vmul.f32 %v1594_v53, %v503_v60  ;;  %v2332_v54 = vsub.f32 %v2010_v58, %v2018_v6  ;;  %v505_v6 = vld [vmem:[#allocation4 + $0x38] sm:$0xff] }
 0x280   :  { %v1279_v32 = vsel %vm251_vm3, %v1278_v46, 0.0 }
 0x281   :  { %819 = vst.msk [vmem:[#allocation4] sm:$0xff] %vm180_vm4, %v786_v37  ;;  %1597 = vlog2.f32 %v786_v37  ;;  %v1282_v44 = vsel %vm1281_vm7, %v1279_v32, 0.0  ;;  %v724_v31 = vmul.f32 1.442695, %v2332_v54 }
 0x282   :  { %1283 = vadd.xlane.f32.xlu2 %v1282_v44  ;;  %1599 = vpow2.f32 %v712_v29  ;;  %v726_v29 = vmul.f32 1.442695, %v2333_v22  ;;  %v1140_v44 = vld [vmem:[#allocation9] sm:$0x1]  ;;  %v1280_v22 = vld [vmem:[#allocation8] sm:$0x1] }
 0x283   :  { %1601 = vpow2.f32 %v708_v61  ;;  %v504_v61 = vld [vmem:[#allocation4 + $0x30] sm:$0xff] }
 0x284   :  { %1603 = vpow2.f32 %v710_v51  ;;  %v702_v51 = vsub.f32 %v2334_v9, %v1958_v36 }
 0x285   :  { %1605 = vpow2.f32 %v718_v5  ;;  %v508_v5 = vld [vmem:[#allocation4 + $0x50] sm:$0xff] }
 0x286   :  { %v765_v18 = vpop.xlane.xlu2 %764  ;;  %1607 = vpow2.f32 %v720_v12 }
 0x287   :  { %v1598_v52 = vpop.eup %1597  ;;  %v791_v62 = vadd.f32 %v765_v18, %v743_v38  ;;  %1609 = vpow2.f32 %v724_v31  ;;  %v2339_v31 = vld [vmem:[#allocation24_spill] sm:$0xff] }
 0x288   :  { %v1169_v35 = vmul.f32 0.6931472, %v1598_v52  ;;  %v763_v47 = vpop.xlane.xlu1 %762  ;;  %v1600_v0 = vpop.eup %1599  ;;  %1611 = vpow2.f32 %v726_v29 }
 0x289   :  { %824 = vst.msk [vmem:[#allocation4 + $0x28] sm:$0xff] %vm180_vm4, %v791_v62  ;;  %v790_v42 = vadd.f32 %v763_v47, %v742_v43  ;;  %v1093_v49 = vpop.xlane.xlu0 %1092  ;;  %v1602_v16 = vpop.eup %1601  ;;  %v741_v2 = vmul.f32 %v1600_v0, %v501_v1  ;;  %v730_v43 = vmul.f32 1.442695, %v702_v51  ;;  %v2335_v47 = vld [vmem:[#allocation25_spill] sm:$0xff]  ;;  %v507_v0 = vld [vmem:[#allocation4 + $0x48] sm:$0xff] }
 0x28a   :  { %v1200_v34 = vadd.f32 %v1169_v35, %v1929_v30  ;;  %v1156_v19 = vrot.slane %v1093_v49, 4  ;;  %770 = vadd.xlane.f32.xlu2 %v2205_v25  ;;  %v1604_v15 = vpop.eup %1603  ;;  %v739_v27 = vmul.f32 %v1602_v16, %v499_v23  ;;  %v2336_v36 = vsub.f32 %v2335_v47, %v1986_v48  ;;  %v2342_v51 = vld [vmem:[#allocation26_spill] sm:$0xff] }
 0x28b   :  { %823 = vst.msk [vmem:[#allocation4 + $0x20] sm:$0xff] %vm180_vm4, %v790_v42  ;;  %v740_v14 = vmul.f32 %v1604_v15, %v500_v41  ;;  %v1606_v53 = vpop.eup %1605  ;;  %1613 = vpow2.f32 %v730_v43  ;;  %v511_v41 = vld [vmem:[#allocation4 + $0x68] sm:$0xff] }
 0x28c   :  { %v1233_v28 = vsel %vm180_vm4, %v1200_v34, 0.0  ;;  %v1157_v33 = vadd.f32 %v1156_v19, %v1093_v49  ;;  %v1608_v60 = vpop.eup %1607  ;;  %v744_v13 = vmul.f32 %v1606_v53, %v504_v61  ;;  %v732_v42 = vmul.f32 1.442695, %v2336_v36 }
 0x28d   :  { %v1264_v24 = vrot.slane %v1233_v28, 4  ;;  %v745_v38 = vmul.f32 %v1608_v60, %v505_v6  ;;  %v1610_v49 = vpop.eup %1609  ;;  %v506_v60 = vld [vmem:[#allocation4 + $0x40] sm:$0xff] }
 0x28e   :  { %v1158_v30 = vrot.slane %v1157_v33, 2  ;;  %v761_v26 = vpop.xlane.xlu2 %760  ;;  %v1612_v57 = vpop.eup %1611  ;;  %1615 = vpow2.f32 %v732_v42  ;;  %v747_v34 = vmul.f32 %v1610_v49, %v507_v0 }
 0x28f   :  { %v1265_v25 = vadd.f32 %v1264_v24, %v1233_v28  ;;  %v789_v21 = vadd.f32 %v761_v26, %v741_v2  ;;  %v748_v1 = vmul.f32 %v1612_v57, %v508_v5  ;;  %v510_v2 = vld [vmem:[#allocation4 + $0x60] sm:$0xff] }
 0x290   :  { %v1159_v55 = vadd.f32 %v1158_v30, %v1157_v33  ;;  %v757_v50 = vpop.xlane.xlu1 %756 }
 0x291   :  { %v1266_v8 = vrot.slane %v1265_v25, 2  ;;  %822 = vst.msk [vmem:[#allocation4 + $0x18] sm:$0xff] %vm180_vm4, %v789_v21  ;;  %v787_v10 = vadd.f32 %v757_v50, %v739_v27  ;;  %v759_v17 = vpop.xlane.xlu0 %758  ;;  %v1614_v24 = vpop.eup %1613 }
 0x292   :  { %v1160_v46 = vrot.slane %v1159_v55, 1  ;;  %v788_v37 = vadd.f32 %v759_v17, %v740_v14  ;;  %776 = vadd.xlane.f32.xlu2 %v2216_v45  ;;  %v1232_v45 = vld [vmem:[#allocation7] sm:$0x1]  ;;  %v750_v26 = vmul.f32 %v1614_v24, %v510_v2 }
 0x293   :  { %v1267_v32 = vadd.f32 %v1266_v8, %v1265_v25  ;;  %820 = vst.msk [vmem:[#allocation4 + $0x8] sm:$0xff] %vm180_vm4, %v787_v10  ;;  %v513_v8 = vld [vmem:[#allocation4 + $0x78] sm:$0xff] }
 0x294   :  { %v1161_v56 = vadd.f32 %v1160_v46, %v1159_v55  ;;  %821 = vst.msk [vmem:[#allocation4 + $0x10] sm:$0xff] %vm180_vm4, %v788_v37  ;;  %v698_v46 = vsub.f32 %v2339_v31, %v1963_v40  ;;  %v2343_v40 = vsub.f32 %v2342_v51, %v2021_v11 }
 0x295   :  { %v1268_v58 = vrot.slane %v1267_v32, 1 }
 0x296   :  { %v1162_v39 = vadd.f32 %v1161_v56, %v1140_v44  ;;  %v722_v37 = vmul.f32 1.442695, %v698_v46  ;;  %v2340_v44 = vld [vmem:[#allocation27_spill] sm:$0xff] }
 0x297   :  { %v1269_v20 = vadd.f32 %v1268_v58, %v1267_v32  ;;  %v2341_v53 = vsub.f32 %v2340_v44, %v2050_v3 }
 0x298   :  { %1164 = vst.msk [vmem:[#allocation9] sm:$0x1] %vm54_vm6, %v1162_v39  ;;  %v767_v63 = vpop.xlane.xlu1 %766 }
 0x299   :  { %v1270_v18 = vadd.f32 %v1269_v20, %v1232_v45  ;;  %v792_v52 = vadd.f32 %v767_v63, %v744_v13  ;;  %v769_v62 = vpop.xlane.xlu0 %768  ;;  %v728_v56 = vmul.f32 1.442695, %v2341_v53  ;;  %v734_v45 = vmul.f32 1.442695, %v2343_v40  ;;  %v509_v13 = vld [vmem:[#allocation4 + $0x58] sm:$0xff] }
 0x29a   :  { %v793_v35 = vadd.f32 %v769_v62, %v745_v38  ;;  %782 = vadd.xlane.f32.xlu2 %v2219_v7  ;;  %v2337_v7 = vld [vmem:[#allocation28_spill] sm:$0xff] }
 0x29b   :  { %1272 = vst.msk [vmem:[#allocation7] sm:$0x1] %vm54_vm6, %v1270_v18  ;;  %v2338_v59 = vsub.f32 %v2337_v7, %v2075_v4  ;;  %v1616_v4 = vpop.eup %1615 }
 0x29c   :  { %825 = vst.msk [vmem:[#allocation4 + $0x30] sm:$0xff] %vm180_vm4, %v792_v52  ;;  %v751_v21 = vmul.f32 %v1616_v4, %v511_v41 }
 0x29d   :  { %826 = vst.msk [vmem:[#allocation4 + $0x38] sm:$0xff] %vm180_vm4, %v793_v35  ;;  %v736_v48 = vmul.f32 1.442695, %v2338_v59  ;;  %v512_v35 = vld [vmem:[#allocation4 + $0x70] sm:$0xff] }
 0x29f   :  { %v1291_v23 = vld [vmem:[#allocation9] sm:$0x1]  ;;  %1617 = vpow2.f32 %v736_v48 }
 0x2a0   :  { %v773_v19 = vpop.xlane.xlu1 %772  ;;  %1619 = vpow2.f32 %v722_v37 }
 0x2a1   :  { %v795_v12 = vadd.f32 %v773_v19, %v747_v34  ;;  %v775_v16 = vpop.xlane.xlu0 %774  ;;  %1621 = vpow2.f32 %v728_v56 }
 0x2a2   :  { %v796_v28 = vadd.f32 %v775_v16, %v748_v1  ;;  %v1290_v33 = vld [vmem:[#allocation7] sm:$0x1]  ;;  %1623 = vpow2.f32 %v734_v45 }
 0x2a3   :  { %828 = vst.msk [vmem:[#allocation4 + $0x48] sm:$0xff] %vm180_vm4, %v795_v12  ;;  %v1292_v15 = vsub.f32 %v1290_v33, %v1291_v23 }
 0x2a4   :  { %829 = vst.msk [vmem:[#allocation4 + $0x50] sm:$0xff] %vm180_vm4, %v796_v28 }
 0x2a5   :  { %v1293_v30 = vmul.f32 0.125, %v1292_v15  ;;  %v1618_v14 = vpop.eup %1617 }
 0x2a6   :  { %v753_v10 = vmul.f32 %v1618_v14, %v513_v8  ;;  %v1620_v61 = vpop.eup %1619 }
 0x2a7   :  { %1301 = vst.msk [vmem:[#allocation16] sm:$0x1] %vm54_vm6, %v1293_v30  ;;  %v746_v58 = vmul.f32 %v1620_v61, %v506_v60  ;;  %v1622_v20 = vpop.eup %1621 }
 0x2a8   :  { %v779_v25 = vpop.xlane.xlu1 %778  ;;  %1324 = dma.vmem_to_hbm [thread:$0]  %s1320_s1, 16, %s1322_s5, [#allocation17]   ;;  %v749_v38 = vmul.f32 %v1622_v20, %v509_v13  ;;  %v1624_v43 = vpop.eup %1623 }
 0x2a9   :  { %v798_v27 = vadd.f32 %v779_v25, %v750_v26  ;;  %v781_v55 = vpop.xlane.xlu0 %780  ;;  %v752_v47 = vmul.f32 %v1624_v43, %v512_v35 }
 0x2aa   :  { %v799_v50 = vadd.f32 %v781_v55, %v751_v21 }
 0x2ab   :  { %831 = vst.msk [vmem:[#allocation4 + $0x60] sm:$0xff] %vm180_vm4, %v798_v27 }
 0x2ac   :  { %832 = vst.msk [vmem:[#allocation4 + $0x68] sm:$0xff] %vm180_vm4, %v799_v50 }
 0x2b0   :  { %v785_v17 = vpop.xlane.xlu1 %784 }
 0x2b1   :  { %v801_v54 = vadd.f32 %v785_v17, %v753_v10 }
 0x2b3   :  { %834 = vst.msk [vmem:[#allocation4 + $0x78] sm:$0xff] %vm180_vm4, %v801_v54 }
 0x2f5   :  { %v1284_v29 = vpop.xlane.xlu2 %1283 }
 0x2f6   :  { %v1285_v32 = vadd.f32 %v1284_v29, %v1280_v22 }
 0x2f8   :  { %1287 = vst.msk [vmem:[#allocation8] sm:$0x1] %vm54_vm6, %v1285_v32 }
 0x2fd   :  { %v771_v6 = vpop.xlane.xlu2 %770 }
 0x2fe   :  { %v794_v9 = vadd.f32 %v771_v6, %v746_v58 }
 0x2ff   :  { %v1294_v39 = vld [vmem:[#allocation8] sm:$0x1] }
 0x300   :  { %827 = vst.msk [vmem:[#allocation4 + $0x40] sm:$0xff] %vm180_vm4, %v794_v9  ;;  %v1295_v3 = vsub.f32 %v1294_v39, %v1291_v23 }
 0x302   :  { %v1296_v63 = vmul.f32 0.125, %v1295_v3 }
 0x304   :  { %v1297_v18 = vadd.f32 %v1296_v63, %v1293_v30  ;;  %1302 = vst.msk [vmem:[#allocation18] sm:$0x1] %vm54_vm6, %v1296_v63 }
 0x305   :  { %v777_v11 = vpop.xlane.xlu2 %776  ;;  %1335 = dma.vmem_to_hbm [thread:$0]  %s1331_s6, 16, %s1333_s9, [#allocation17]  }
 0x306   :  { %v797_v52 = vadd.f32 %v777_v11, %v749_v38  ;;  %v1298_v62 = vmul.f32 0.5, %v1297_v18 }
 0x308   :  { %830 = vst.msk [vmem:[#allocation4 + $0x58] sm:$0xff] %vm180_vm4, %v797_v52 }
 0x309   :  { %1300 = vst.msk [vmem:[#allocation15] sm:$0x1] %vm54_vm6, %v1298_v62 }
 0x30a   :  { %1313 = dma.vmem_to_hbm [thread:$0]  %s1309_s11, 16, %s1311_s14, [#allocation12]  }
 0x30d   :  { %v783_v36 = vpop.xlane.xlu2 %782 }
 0x30e   :  { %v800_v42 = vadd.f32 %v783_v36, %v752_v47 }
 0x310   :  { %833 = vst.msk [vmem:[#allocation4 + $0x70] sm:$0xff] %vm180_vm4, %v800_v42 }
 0x311   :  { %1749 = dma.done.wait [#allocation12], 16  }
 0x312   :  { %1750 = vsyncadd [#allocation12], 4294967280 }
 0x313   :  { %1751 = dma.done.wait [#allocation17], 32  }
 0x314   :  { %1752 = vsyncadd [#allocation17], 4294967264 }
 0x315   :  { %1348 = vsyncpa [#allocation11], 1 }
 0x316   :  { %1349 = vsyncpa [#allocation14], 1 }
 0x317   :  { %1350 = vsyncpa [#allocation12], 1 }
 0x318   :  { %1351 = vsyncpa [#allocation17], 1 }

</bundles_post_ra>
